<compile_context>
chip_gen: v7x
topology: tpu7x:2x2x1
jax: 0.10.0
libtpu: 0.0.40
codegen_flags: <defaults>
</compile_context>

<pallas_src>
import math

import jax
import jax.numpy as jnp
from jax.experimental import pallas as pl
from jax.experimental.pallas import tpu as pltpu

# ------------------------- model configuration (small) -------------------------
NUM_LEVELS = 4          # GridEncoder num_levels
LEVEL_DIM = 8           # GridEncoder level_dim
BASE_RES = 16           # GridEncoder base_resolution
PER_LEVEL_SCALE = 2.0   # GridEncoder per_level_scale
LOG2_HASHMAP = 12       # GridEncoder log2_hashmap_size (small for demo)
MLP_WIDTH = 64          # MLP hidden_dim
IMAGE_REP = 32          # image_rep_size
CLIP_REP = 32           # clip_region_rep_size
ST_REP = 32             # st_region_rep_size
BOUNDS = 10.0           # default bounds

LC = NUM_LEVELS * LEVEL_DIM            # 32   grid-encoder feature width
PACKED = 8 * LC                        # 256  corner-packed feature width (lane dense)
NW = 8 * NUM_LEVELS                    # 32   compact trilinear weights per point
DOUT = IMAGE_REP + CLIP_REP + ST_REP   # 96   true output width
DOUT_PAD = -(-DOUT // 128) * 128       # 128  lane-dense (unmasked store) output width

_PRIMES = (1, 2654435761, 805459861)   # instant-ngp / torch-ngp spatial hash primes


# ------------------------------ Pallas kernel ---------------------------------
def _interp_mlp_kernel(f_ref, w_ref, e_ref, w1_ref, b1_ref, w2_ref, b2_ref,
                       w3_ref, b3_ref, o_ref):
    # f_ref: (TN, 256) corner-packed grid features, layout [corner, level, chan]
    # w_ref: (TN, 32)  compact trilinear corner weights, layout [corner, level]
    # e_ref: (32, 256) constant 0/1 expansion matrix (repeat each weight 8x on lanes)
    # w1_ref: (256, H) = W1 tiled 8x along K  -> corner-sum folded into this matmul
    # w3_ref/b3_ref: zero-padded to 128 output lanes.
    w_exp = jnp.dot(w_ref[...], e_ref[...], preferred_element_type=jnp.float32)
    g = f_ref[...] * w_exp                                            # (TN, 256)
    # MLP (hidden_depth=2): Linear->ReLU->Linear->ReLU->Linear, no batchnorm.
    h = jnp.maximum(
        jnp.dot(g, w1_ref[...], preferred_element_type=jnp.float32) + b1_ref[...], 0.0)
    h = jnp.maximum(
        jnp.dot(h, w2_ref[...], preferred_element_type=jnp.float32) + b2_ref[...], 0.0)
    o_ref[...] = jnp.dot(h, w3_ref[...], preferred_element_type=jnp.float32) + b3_ref[...]


def fused_interp_mlp(feats_packed, w_compact, w1, b1, w2, b2, w3, b3, *, tn=512):
    """feats_packed: (N, 256), w_compact: (N, 32) -> (N, DOUT) MLP output."""
    n = feats_packed.shape[0]
    hidden = w1.shape[1]

    # Pad the point dimension up to a multiple of the row tile.
    n_pad = -(-n // tn) * tn
    if n_pad != n:
        feats_packed = jnp.pad(feats_packed, ((0, n_pad - n), (0, 0)))
        w_compact = jnp.pad(w_compact, ((0, n_pad - n), (0, 0)))

    # Layout prep (tiny, fused by XLA under jit).
    w1t = jnp.tile(w1, (8, 1))                                    # (256, H)
    w3p = jnp.pad(w3, ((0, 0), (0, DOUT_PAD - DOUT)))             # (H, 128)
    b3p = jnp.pad(b3, ((0, 0), (0, DOUT_PAD - DOUT)))             # (1, 128)
    expand = (jnp.arange(PACKED)[None, :] // LEVEL_DIM
              == jnp.arange(NW)[:, None]).astype(jnp.float32)     # (32, 256)

    out = pl.pallas_call(
        _interp_mlp_kernel,
        out_shape=jax.ShapeDtypeStruct((n_pad, DOUT_PAD), jnp.float32),
        grid=(n_pad // tn,),
        in_specs=[
            pl.BlockSpec((tn, PACKED), lambda i: (i, 0)),         # features (streamed)
            pl.BlockSpec((tn, NW), lambda i: (i, 0)),             # compact weights (streamed)
            pl.BlockSpec((NW, PACKED), lambda i: (0, 0)),         # expansion matrix
            pl.BlockSpec((PACKED, hidden), lambda i: (0, 0)),     # W1 tiled
            pl.BlockSpec((1, hidden), lambda i: (0, 0)),
            pl.BlockSpec((hidden, hidden), lambda i: (0, 0)),     # W2
            pl.BlockSpec((1, hidden), lambda i: (0, 0)),
            pl.BlockSpec((hidden, DOUT_PAD), lambda i: (0, 0)),   # W3 (padded)
            pl.BlockSpec((1, DOUT_PAD), lambda i: (0, 0)),
        ],
        out_specs=pl.BlockSpec((tn, DOUT_PAD), lambda i: (i, 0)),
        compiler_params=pltpu.CompilerParams(
            dimension_semantics=("parallel",),
            vmem_limit_bytes=32 * 1024 * 1024),
    )(feats_packed, w_compact, expand, w1t, b1, w2, b2, w3p, b3p)
    return out[:n, :DOUT]


# --------------------------- hash-grid glue (JAX) ------------------------------
def _level_metadata():
    max_params = 2 ** LOG2_HASHMAP
    offsets, sizes, offset = [], [], 0
    for level in range(NUM_LEVELS):
        res = int(math.ceil(BASE_RES * (PER_LEVEL_SCALE ** level)))
        p = min(max_params, (res + 1) ** 3)          # align_corners=False
        p = int(math.ceil(p / 8) * 8)                # make divisible by 8
        offsets.append(offset)
        sizes.append(p)
        offset += p
    return offsets, sizes, offset


def hash_grid_gather(x01, table):
    """torch-ngp GridEncoder hashing + corner gather.

    x01: (N, 3) in [0, 1].  Returns lane-dense packed corner features
    (N, 8*L*C) with layout [corner, level, channel] and compact trilinear
    corner weights (N, 8*L) with layout [corner, level].
    """
    # TODO(synk): the data-dependent gather into the hash table stays in plain
    # JAX (jnp.take); an in-kernel vectorized row-gather from a VMEM-resident
    # table has no clean Pallas TPU primitive.
    n = x01.shape[0]
    offsets, sizes, _ = _level_metadata()
    log2_s = math.log2(PER_LEVEL_SCALE)
    # Clamp so slightly out-of-bound points can't produce a negative floor that
    # wraps through the uint32 hash.
    x01 = jnp.clip(x01, 0.0, 1.0)

    idx_levels, w_levels = [], []
    for level in range(NUM_LEVELS):
        scale = (2.0 ** (level * log2_s)) * BASE_RES - 1.0
        resolution = int(math.ceil(scale)) + 1
        stride_dim = resolution + 1                  # align_corners=False
        hashmap_size = sizes[level]

        pos = x01 * scale + 0.5                      # align_corners=False offset
        pos_grid = jnp.floor(pos)
        frac = pos - pos_grid
        pg = pos_grid.astype(jnp.uint32)

        idx_corners, w_corners = [], []
        for corner in range(8):
            bits = [(corner >> d) & 1 for d in range(3)]
            cg = pg + jnp.array(bits, dtype=jnp.uint32)          # (N, 3)
            w = jnp.ones((n,), jnp.float32)
            for d in range(3):
                w = w * (frac[:, d] if bits[d] else (1.0 - frac[:, d]))
            # get_grid_index: tiled index while stride fits, else spatial hash.
            stride = 1
            index = jnp.zeros((n,), jnp.uint32)
            for d in range(3):
                if stride <= hashmap_size:
                    index = index + cg[:, d] * jnp.uint32(stride)
                    stride *= stride_dim
            if stride > hashmap_size:                # gridtype == 'hash'
                index = ((cg[:, 0] * jnp.uint32(_PRIMES[0]))
                         ^ (cg[:, 1] * jnp.uint32(_PRIMES[1]))
                         ^ (cg[:, 2] * jnp.uint32(_PRIMES[2])))
            idx = (index % jnp.uint32(hashmap_size)).astype(jnp.int32) + offsets[level]
            idx_corners.append(idx)
            w_corners.append(w)

        idx_levels.append(jnp.stack(idx_corners, axis=-1))       # (N, 8)
        w_levels.append(jnp.stack(w_corners, axis=-1))           # (N, 8)

    idx_all = jnp.stack(idx_levels, axis=-1)                     # (N, 8, L)
    w_all = jnp.stack(w_levels, axis=-1)                         # (N, 8, L)
    feats = jnp.take(table, idx_all, axis=0)                     # (N, 8, L, C)
    feats_packed = feats.reshape(n, PACKED)                      # (N, 256)
    w_compact = w_all.reshape(n, NW)                             # (N, 32)
    return feats_packed, w_compact


# ------------------------------- full forward ----------------------------------
def grid_clip_region_forward(x, params, min_bounds, max_bounds, *, tn=512):
    # bounded_x = (x - min) / (max - min)  -> [0, 1]
    bounded_x = (x - min_bounds) / (max_bounds - min_bounds)
    # GridEncoder(bound=1.0) internally remaps inputs from [-1, 1] to [0, 1].
    x01 = (bounded_x + 1.0) / 2.0
    feats_packed, w_compact = hash_grid_gather(x01, params["embeddings"])
    result = fused_interp_mlp(
        feats_packed, w_compact,
        params["w1"], params["b1"],
        params["w2"], params["b2"],
        params["w3"], params["b3"],
        tn=tn,
    )
    image_latent = result[..., :IMAGE_REP]
    clip_region_latent = result[..., IMAGE_REP:IMAGE_REP + CLIP_REP]
    st_region_latent = result[..., IMAGE_REP + CLIP_REP:IMAGE_REP + CLIP_REP + ST_REP]
    return image_latent, clip_region_latent, st_region_latent


# ------------------------------ parameter init ---------------------------------
def init_params(key):
    _, _, total = _level_metadata()
    dout = DOUT
    ks = jax.random.split(key, 4)
    # torch-ngp: embeddings ~ U(-1e-4, 1e-4)
    emb = jax.random.uniform(ks[0], (total, LEVEL_DIM), jnp.float32, -1e-4, 1e-4)

    def linear(k, fan_in, fan_out):
        bound = 1.0 / math.sqrt(fan_in)
        kw, kb = jax.random.split(k)
        w = jax.random.uniform(kw, (fan_in, fan_out), jnp.float32, -bound, bound)
        b = jax.random.uniform(kb, (1, fan_out), jnp.float32, -bound, bound)
        return w, b

    w1, b1 = linear(ks[1], LC, MLP_WIDTH)
    w2, b2 = linear(ks[2], MLP_WIDTH, MLP_WIDTH)
    w3, b3 = linear(ks[3], MLP_WIDTH, dout)
    temperature = jnp.log(jnp.array(1.0 / 0.07, jnp.float32))    # unused in forward
    return dict(embeddings=emb, w1=w1, b1=b1, w2=w2, b2=b2, w3=w3, b3=b3,
                temperature=temperature)


if __name__ == "__main__":
    key = jax.random.PRNGKey(0)
    pkey, xkey = jax.random.split(key)
    params = init_params(pkey)

    # N deliberately not a multiple of the row tile to exercise the padding path;
    # padded grid has 2 steps so both v7x TensorCores get work.
    N = 1000
    x = jax.random.uniform(xkey, (N, 3), jnp.float32, -BOUNDS, BOUNDS)
    min_bounds = -jnp.ones((3,), jnp.float32) * BOUNDS
    max_bounds = jnp.ones((3,), jnp.float32) * BOUNDS

    fwd = jax.jit(grid_clip_region_forward)
    image_latent, clip_latent, st_latent = fwd(x, params, min_bounds, max_bounds)
    jax.block_until_ready((image_latent, clip_latent, st_latent))

    assert image_latent.shape == (N, IMAGE_REP)
    assert clip_latent.shape == (N, CLIP_REP)
    assert st_latent.shape == (N, ST_REP)
    assert bool(jnp.all(jnp.isfinite(image_latent)))
    print("KERNEL_OK")
</pallas_src>

<mosaic_0001>
module attributes {stable_mosaic.version = 11 : i64} {
  func.func private @main(%arg0: i32) attributes {dimension_semantics = [#tpu.dimension_semantics<core_parallel>], iteration_bounds = array<i64: 2>, tpu.core_type = #tpu.core_type<sc_scalar_subcore>, window_params = []} {
    return
  }
}

module attributes {stable_mosaic.version = 11 : i64} {
  func.func private @main(%arg0: i32) attributes {dimension_semantics = [#tpu.dimension_semantics<core_parallel>], iteration_bounds = array<i64: 2>, tpu.core_type = #tpu.core_type<sc_scalar_subcore>, window_params = []} {
    return
  }
}

module attributes {stable_mosaic.version = 11 : i64} {
  func.func @_interp_mlp_kernel(%arg0: i32, %arg1: memref<512x256xf32, #tpu.memory_space<vmem>>, %arg2: memref<512x32xf32, #tpu.memory_space<vmem>>, %arg3: memref<32x256xf32, #tpu.memory_space<vmem>>, %arg4: memref<256x64xf32, #tpu.memory_space<vmem>>, %arg5: memref<1x64xf32, #tpu.memory_space<vmem>>, %arg6: memref<64x64xf32, #tpu.memory_space<vmem>>, %arg7: memref<1x64xf32, #tpu.memory_space<vmem>>, %arg8: memref<64x128xf32, #tpu.memory_space<vmem>>, %arg9: memref<1x128xf32, #tpu.memory_space<vmem>>, %arg10: memref<512x128xf32, #tpu.memory_space<vmem>>) attributes {dimension_semantics = [#tpu.dimension_semantics<parallel>], iteration_bounds = array<i64: 2>, scalar_prefetch = 0 : i64, scratch_operands = 0 : i64, tpu.core_type = #tpu.core_type<tc>, window_params = [{transform_indices = @transform_0, window_bounds = array<i64: 512, 256>}, {transform_indices = @transform_1, window_bounds = array<i64: 512, 32>}, {pipeline_mode = #tpu.pipeline_mode<synchronous>, transform_indices = @transform_2, window_bounds = array<i64: 32, 256>}, {pipeline_mode = #tpu.pipeline_mode<synchronous>, transform_indices = @transform_3, window_bounds = array<i64: 256, 64>}, {pipeline_mode = #tpu.pipeline_mode<synchronous>, transform_indices = @transform_4, window_bounds = array<i64: 1, 64>}, {pipeline_mode = #tpu.pipeline_mode<synchronous>, transform_indices = @transform_5, window_bounds = array<i64: 64, 64>}, {pipeline_mode = #tpu.pipeline_mode<synchronous>, transform_indices = @transform_6, window_bounds = array<i64: 1, 64>}, {pipeline_mode = #tpu.pipeline_mode<synchronous>, transform_indices = @transform_7, window_bounds = array<i64: 64, 128>}, {pipeline_mode = #tpu.pipeline_mode<synchronous>, transform_indices = @transform_8, window_bounds = array<i64: 1, 128>}, {transform_indices = @transform_9, window_bounds = array<i64: 512, 128>}]} {
    %c0 = arith.constant 0 : index
    %c0_0 = arith.constant 0 : index
    %0 = vector.load %arg2[%c0, %c0_0] : memref<512x32xf32, #tpu.memory_space<vmem>>, vector<512x32xf32>
    %c0_1 = arith.constant 0 : index
    %c0_2 = arith.constant 0 : index
    %1 = vector.load %arg3[%c0_1, %c0_2] : memref<32x256xf32, #tpu.memory_space<vmem>>, vector<32x256xf32>
    %cst = arith.constant dense<0.000000e+00> : vector<512x256xf32>
    %2 = tpu.matmul %0, %1, %cst {dimension_numbers = #tpu.dot_dimension_numbers<[1], [0], [0], [1], [0, 0, 1, 1], [], []>} : vector<512x32xf32>, vector<32x256xf32>, vector<512x256xf32> -> vector<512x256xf32>
    %c0_3 = arith.constant 0 : index
    %c0_4 = arith.constant 0 : index
    %3 = vector.load %arg1[%c0_3, %c0_4] : memref<512x256xf32, #tpu.memory_space<vmem>>, vector<512x256xf32>
    %4 = arith.mulf %3, %2 : vector<512x256xf32>
    %c0_5 = arith.constant 0 : index
    %c0_6 = arith.constant 0 : index
    %5 = vector.load %arg4[%c0_5, %c0_6] : memref<256x64xf32, #tpu.memory_space<vmem>>, vector<256x64xf32>
    %cst_7 = arith.constant dense<0.000000e+00> : vector<512x64xf32>
    %6 = tpu.matmul %4, %5, %cst_7 {dimension_numbers = #tpu.dot_dimension_numbers<[1], [0], [0], [1], [0, 0, 1, 1], [], []>} : vector<512x256xf32>, vector<256x64xf32>, vector<512x64xf32> -> vector<512x64xf32>
    %c0_8 = arith.constant 0 : index
    %c0_9 = arith.constant 0 : index
    %7 = vector.load %arg5[%c0_8, %c0_9] : memref<1x64xf32, #tpu.memory_space<vmem>>, vector<1x64xf32>
    %8 = vector.broadcast %7 : vector<1x64xf32> to vector<512x64xf32>
    %9 = arith.addf %6, %8 : vector<512x64xf32>
    %cst_10 = arith.constant 0.000000e+00 : f32
    %10 = vector.broadcast %cst_10 : f32 to vector<512x64xf32>
    %11 = arith.maximumf %9, %10 : vector<512x64xf32>
    %c0_11 = arith.constant 0 : index
    %c0_12 = arith.constant 0 : index
    %12 = vector.load %arg6[%c0_11, %c0_12] : memref<64x64xf32, #tpu.memory_space<vmem>>, vector<64x64xf32>
    %cst_13 = arith.constant dense<0.000000e+00> : vector<512x64xf32>
    %13 = tpu.matmul %11, %12, %cst_13 {dimension_numbers = #tpu.dot_dimension_numbers<[1], [0], [0], [1], [0, 0, 1, 1], [], []>} : vector<512x64xf32>, vector<64x64xf32>, vector<512x64xf32> -> vector<512x64xf32>
    %c0_14 = arith.constant 0 : index
    %c0_15 = arith.constant 0 : index
    %14 = vector.load %arg7[%c0_14, %c0_15] : memref<1x64xf32, #tpu.memory_space<vmem>>, vector<1x64xf32>
    %15 = vector.broadcast %14 : vector<1x64xf32> to vector<512x64xf32>
    %16 = arith.addf %13, %15 : vector<512x64xf32>
    %cst_16 = arith.constant 0.000000e+00 : f32
    %17 = vector.broadcast %cst_16 : f32 to vector<512x64xf32>
    %18 = arith.maximumf %16, %17 : vector<512x64xf32>
    %c0_17 = arith.constant 0 : index
    %c0_18 = arith.constant 0 : index
    %19 = vector.load %arg8[%c0_17, %c0_18] : memref<64x128xf32, #tpu.memory_space<vmem>>, vector<64x128xf32>
    %cst_19 = arith.constant dense<0.000000e+00> : vector<512x128xf32>
    %20 = tpu.matmul %18, %19, %cst_19 {dimension_numbers = #tpu.dot_dimension_numbers<[1], [0], [0], [1], [0, 0, 1, 1], [], []>} : vector<512x64xf32>, vector<64x128xf32>, vector<512x128xf32> -> vector<512x128xf32>
    %c0_20 = arith.constant 0 : index
    %c0_21 = arith.constant 0 : index
    %21 = vector.load %arg9[%c0_20, %c0_21] : memref<1x128xf32, #tpu.memory_space<vmem>>, vector<1x128xf32>
    %22 = vector.broadcast %21 : vector<1x128xf32> to vector<512x128xf32>
    %23 = arith.addf %20, %22 : vector<512x128xf32>
    %c0_22 = arith.constant 0 : index
    %c0_23 = arith.constant 0 : index
    %24 = vector.load %arg10[%c0_22, %c0_23] : memref<512x128xf32, #tpu.memory_space<vmem>>, vector<512x128xf32>
    tpu.vector_store %arg10[%c0_22, %c0_23], %23 {strides = array<i32>} : memref<512x128xf32, #tpu.memory_space<vmem>>, vector<512x128xf32>,
    return
  }
  func.func @transform_0(%arg0: i32) -> (i32, i32) {
    %c0_i32 = arith.constant 0 : i32
    %c0_i32_0 = arith.constant 0 : i32
    return %arg0, %c0_i32 : i32, i32
  }
  func.func @transform_1(%arg0: i32) -> (i32, i32) {
    %c0_i32 = arith.constant 0 : i32
    %c0_i32_0 = arith.constant 0 : i32
    return %arg0, %c0_i32 : i32, i32
  }
  func.func @transform_2(%arg0: i32) -> (i32, i32) {
    %c0_i32 = arith.constant 0 : i32
    %c0_i32_0 = arith.constant 0 : i32
    %c0_i32_1 = arith.constant 0 : i32
    return %c0_i32, %c0_i32_0 : i32, i32
  }
  func.func @transform_3(%arg0: i32) -> (i32, i32) {
    %c0_i32 = arith.constant 0 : i32
    %c0_i32_0 = arith.constant 0 : i32
    %c0_i32_1 = arith.constant 0 : i32
    return %c0_i32, %c0_i32_0 : i32, i32
  }
  func.func @transform_4(%arg0: i32) -> (i32, i32) {
    %c0_i32 = arith.constant 0 : i32
    %c0_i32_0 = arith.constant 0 : i32
    %c0_i32_1 = arith.constant 0 : i32
    return %c0_i32, %c0_i32_0 : i32, i32
  }
  func.func @transform_5(%arg0: i32) -> (i32, i32) {
    %c0_i32 = arith.constant 0 : i32
    %c0_i32_0 = arith.constant 0 : i32
    %c0_i32_1 = arith.constant 0 : i32
    return %c0_i32, %c0_i32_0 : i32, i32
  }
  func.func @transform_6(%arg0: i32) -> (i32, i32) {
    %c0_i32 = arith.constant 0 : i32
    %c0_i32_0 = arith.constant 0 : i32
    %c0_i32_1 = arith.constant 0 : i32
    return %c0_i32, %c0_i32_0 : i32, i32
  }
  func.func @transform_7(%arg0: i32) -> (i32, i32) {
    %c0_i32 = arith.constant 0 : i32
    %c0_i32_0 = arith.constant 0 : i32
    %c0_i32_1 = arith.constant 0 : i32
    return %c0_i32, %c0_i32_0 : i32, i32
  }
  func.func @transform_8(%arg0: i32) -> (i32, i32) {
    %c0_i32 = arith.constant 0 : i32
    %c0_i32_0 = arith.constant 0 : i32
    %c0_i32_1 = arith.constant 0 : i32
    return %c0_i32, %c0_i32_0 : i32, i32
  }
  func.func @transform_9(%arg0: i32) -> (i32, i32) {
    %c0_i32 = arith.constant 0 : i32
    %c0_i32_0 = arith.constant 0 : i32
    return %arg0, %c0_i32 : i32, i32
  }
}

</mosaic_0001>

<bundles_post_ra>
// kernel: sub.65
= control target key start
LH: loop header
LB: loop body
LE: loop exit
PB: predicated region body
PF: predicated region fallthrough
CT: control target
= control target key end

     0   :  { %3 = vsyncpa [#allocation1], 0  ;;  %s126_s0 = inlined_call_operand.hbm [shape: f32[3], index: 0, kind: input, shape index: {}]   ;;  %s127_s1 = inlined_call_operand.hbm [shape: f32[3], index: 1, kind: input, shape index: {}]   ;;  %s128_s2 = inlined_call_operand.vmem [shape: f32[3], index: 2, kind: output, shape index: {}]  }
   0x1   :  { %4 = vsyncpa [#allocation3], 0  ;;  %s82_s9 = smov [#allocation0]   ;;  %s83_s11 = smov [#allocation2]  }
   0x2   :  { %s9_s10 = sshll.u32 %s82_s9, 4  ;;  %s17_s12 = sshll.u32 %s83_s11, 4  ;;  %s10_s10 = int_to_ptr.vmem [resolvable:$true] %s9_s10  ;;  %s18_s12 = int_to_ptr.vmem [resolvable:$true] %s17_s12 }
   0x3   :  { %s34_s15 = scalar_lea.hbm %s126_s0, 16 }
   0x4   :  { %p35_p0 = scmp.ne.s32.totalorder %s126_s0, %s34_s15  ;;  %p38_p1 = scmp.lt.u32.totalorder %s34_s15, %s126_s0 }
   0x6   :  { %p40_p2 = pnand %p38_p1, %p35_p0 }
   0x8   :  { %43 = shalt.err (!%p40_p2)
}
   0x9   :  { %s44_s20 = scalar_lea.vmem %s10_s10, 16  ;;  %s48_s21 = scalar_lea.vmem %s10_s10, 32 }
   0xa   :  { %p45_p3 = scmp.ne.s32.totalorder %s10_s10, %s44_s20  ;;  %p49_p4 = scmp.lt.s32.totalorder %s10_s10, %s10_s10 }
   0xb   :  { %p50_p5 = scmp.lt.s32.totalorder %s48_s21, %s44_s20 }
   0xd   :  { %p51_p6 = por %p50_p5, %p49_p4 }
   0xf   :  { %p52_p7 = pnand %p51_p6, %p45_p3 }
  0x11   :  { %55 = shalt.err (!%p52_p7)
}
  0x12   :  { %12 = dma.hbm_to_vmem [thread:$0]  %s126_s0, 16, %s10_s10, [#allocation1]  }
  0x13   :  { %s56_s25 = scalar_lea.hbm %s127_s1, 16 }
  0x14   :  { %p57_p8 = scmp.ne.s32.totalorder %s127_s1, %s56_s25  ;;  %p60_p9 = scmp.lt.u32.totalorder %s56_s25, %s127_s1 }
  0x16   :  { %p62_p10 = pnand %p60_p9, %p57_p8 }
  0x18   :  { %65 = shalt.err (!%p62_p10)
}
  0x19   :  { %s66_s30 = scalar_lea.vmem %s18_s12, 16  ;;  %s70_s3 = scalar_lea.vmem %s18_s12, 32 }
  0x1a   :  { %p67_p11 = scmp.ne.s32.totalorder %s18_s12, %s66_s30  ;;  %p71_p12 = scmp.lt.s32.totalorder %s18_s12, %s18_s12 }
  0x1b   :  { %p72_p13 = scmp.lt.s32.totalorder %s70_s3, %s66_s30 }
  0x1d   :  { %p73_p0 = por %p72_p13, %p71_p12 }
  0x1f   :  { %p74_p1 = pnand %p73_p0, %p67_p11 }
  0x21   :  { %77 = shalt.err (!%p74_p1)
}
  0x22   :  { %20 = dma.hbm_to_vmem [thread:$0]  %s127_s1, 16, %s18_s12, [#allocation3]  }
  0x23   :  { %78 = dma.done.wait [#allocation1], 16  }
  0x24   :  { %79 = vsyncadd [#allocation1], 4294967280 }
  0x25   :  { %80 = dma.done.wait [#allocation3], 16  }
  0x26   :  { %81 = vsyncadd [#allocation3], 4294967280  ;;  %v23_v0 = vld [vmem:[#allocation0] sm:$0x1]  ;;  %v24_v1 = vld [vmem:[#allocation2] sm:$0x1] }
  0x27   :  { %v27_v2 = vsub.f32 %v23_v0, %v24_v1 }
  0x29   :  { %29 = vst [vmem:[%s128_s2] sm:$0x1] %v27_v2 }
  0x2a   :  { %30 = vsyncpa [#allocation1], 1 }
  0x2b   :  { %31 = vsyncpa [#allocation3], 1 }

// kernel: grid_clip_region_forward.1
= control target key start
LH: loop header
LB: loop body
LE: loop exit
PB: predicated region body
PF: predicated region fallthrough
CT: control target
= control target key end

     0   :  { %s3968_s30 = smov 0   ;;  %s4972_s0 = inlined_call_operand.vmem [shape: f32[1024,256], index: 0, kind: input, shape index: {}]   ;;  %s4973_s1 = inlined_call_operand.vmem [shape: f32[1024,32], index: 1, kind: input, shape index: {}]   ;;  %s4974_s2 = inlined_call_operand.vmem [shape: f32[32,256], index: 2, kind: input, shape index: {}]   ;;  %s4975_s3 = inlined_call_operand.vmem [shape: f32[256,64], index: 3, kind: input, shape index: {}]   ;;  %s4976_s4 = inlined_call_operand.vmem [shape: f32[1,64], index: 4, kind: input, shape index: {}]   ;;  %s4977_s5 = inlined_call_operand.vmem [shape: f32[64,64], index: 5, kind: input, shape index: {}]   ;;  %s4978_s6 = inlined_call_operand.vmem [shape: f32[1,64], index: 6, kind: input, shape index: {}]   ;;  %s4979_s7 = inlined_call_operand.vmem [shape: f32[64,128], index: 7, kind: input, shape index: {}]   ;;  %s4980_s8 = inlined_call_operand.vmem [shape: f32[1,128], index: 8, kind: input, shape index: {}]   ;;  %s4981_s9 = inlined_call_operand.vmem [shape: f32[1024,128], index: 9, kind: output, shape index: {}]  }
   0x1 LB: > { %s3200_s10 = sadd.s32 4294967295, %s3914_s30   ;;  %p3204_p0 = scmp.ge.s32.totalorder %s3914_s30, 1  ;;  %s3914_s30 = sphi %s3968_s30, %s19_s30  }
   0x2   : > { %p300_p1 = scmp.lt.s32.totalorder %s3914_s30, 3 }
   0x4   : > { %p301_p2 = pnand %p3204_p0, %p300_p1 }
   0x5   : > { %v426_v0 = vld [vmem:[%s4974_s2 + $0x8] sm:$0xff] (!%p301_p2)  ;;  %v428_v1 = vld [vmem:[%s4974_s2 + $0x18] sm:$0xff] (!%p301_p2)  ;;  %v425_v2 = vld [vmem:[%s4974_s2] sm:$0xff] (!%p301_p2)  ;;  %s3205_s17 = sshll.u32 (!%p301_p2), %s3200_s10, 6  ;;  %v3916_v7 = vmov (!%p301_p2), 0.0   ;;  %v3917_v13 = vmov (!%p301_p2), 0.0|0.0  }
   0x6   : > { %304 = sbr.rel (%p301_p2) target bundleno = 1135 (0x46f), region = 56  ;;  %v3778_v3 = vpack.c.bf16 (!%p301_p2), %v428_v1, %v426_v0  ;;  %v427_v4 = vld [vmem:[%s4974_s2 + $0x10] sm:$0xff] (!%p301_p2)  ;;  %v430_v5 = vld [vmem:[%s4974_s2 + $0x28] sm:$0xff] (!%p301_p2)  ;;  %v432_v6 = vld [vmem:[%s4974_s2 + $0x38] sm:$0xff] (!%p301_p2)  ;;  %690 = vmatprep.mubr.f32.mxu0 (!%p301_p2), %v3916_v7  ;;  %p343_p3 = scmp.lt.s32.totalorder (!%p301_p2), %s3205_s17, 127  ;;  %3866 = vmatprep.subr.bf16.mxu1 (!%p301_p2), %v3917_v13  ;;  %vm433_vm0 = vcmask (!%p301_p2), 261120  }
   0x7   : > { %v3780_v8 = vpack.c.bf16 (!%p301_p2), %v427_v4, %v425_v2  ;;  %v3782_v9 = vpack.c.bf16 (!%p301_p2), %v432_v6, %v430_v5  ;;  %v429_v10 = vld [vmem:[%s4974_s2 + $0x20] sm:$0xff] (!%p301_p2)  ;;  %v431_v11 = vld [vmem:[%s4974_s2 + $0x30] sm:$0xff] (!%p301_p2)  ;;  %v1332_v14 = vld [vmem:[%s4975_s3 + $0x8] sm:$0xff] (!%p301_p2)  ;;  %vm1834_vm1 = vcmask (!%p301_p2), 523264  }
   0x8   : > { %v1331_v12 = vld [vmem:[%s4975_s3] sm:$0xff] (!%p301_p2)  ;;  %3779 = vmatprep.subr.bf16.mxu0 (!%p301_p2), %v3778_v3  ;;  %v1333_v15 = vld [vmem:[%s4975_s3 + $0x10] sm:$0xff] (!%p301_p2)  ;;  %v1334_v16 = vld [vmem:[%s4975_s3 + $0x18] sm:$0xff] (!%p301_p2)  ;;  %v3784_v17 = vpack.c.bf16 (!%p301_p2), %v431_v11, %v429_v10 }
   0x9   : > { %3781 = vmatpush1.bf16.msra.mxu0 (!%p301_p2), %v3780_v8  ;;  %v3787_v18 = vpack.c.bf16 (!%p301_p2), %v1332_v14, %v1331_v12  ;;  %v3790_v19 = vpack.c.bf16 (!%p301_p2), %v1334_v16, %v1333_v15  ;;  %v1335_v20 = vld [vmem:[%s4975_s3 + $0x20] sm:$0xff] (!%p301_p2)  ;;  %v1336_v21 = vld [vmem:[%s4975_s3 + $0x28] sm:$0xff] (!%p301_p2)  ;;  %v1337_v24 = vld [vmem:[%s4975_s3 + $0x30] sm:$0xff] (!%p301_p2) }
   0xa   : > { %3783 = vmatprep.subr.bf16.mxu0 (!%p301_p2), %v3782_v9  ;;  %v3793_v23 = vpack.c.bf16 (!%p301_p2), %v1336_v21, %v1335_v20  ;;  %v1338_v25 = vld [vmem:[%s4975_s3 + $0x38] sm:$0xff] (!%p301_p2)  ;;  %v1339_v30 = vld [vmem:[%s4975_s3 + $0x40] sm:$0xff] (!%p301_p2)  ;;  %v1340_v31 = vld [vmem:[%s4975_s3 + $0x48] sm:$0xff] (!%p301_p2) }
   0xb   : > { %3882 = vmatpush1.bf16.msra.mxu1 (!%p301_p2), %v3787_v18  ;;  %v3796_v27 = vpack.c.bf16 (!%p301_p2), %v1338_v25, %v1337_v24  ;;  %v3799_v32 = vpack.c.bf16 (!%p301_p2), %v1340_v31, %v1339_v30  ;;  %v1341_v37 = vld [vmem:[%s4975_s3 + $0x50] sm:$0xff] (!%p301_p2)  ;;  %v1342_v38 = vld [vmem:[%s4975_s3 + $0x58] sm:$0xff] (!%p301_p2)  ;;  %v1343_v44 = vld [vmem:[%s4975_s3 + $0x60] sm:$0xff] (!%p301_p2) }
   0xc   : > { %3867 = vmatprep.subr.bf16.mxu1 (!%p301_p2), %v3917_v13  ;;  %v3802_v39 = vpack.c.bf16 (!%p301_p2), %v1342_v38, %v1341_v37  ;;  %v1344_v45 = vld [vmem:[%s4975_s3 + $0x68] sm:$0xff] (!%p301_p2)  ;;  %v1345_v51 = vld [vmem:[%s4975_s3 + $0x70] sm:$0xff] (!%p301_p2)  ;;  %v1346_v52 = vld [vmem:[%s4975_s3 + $0x78] sm:$0xff] (!%p301_p2) }
   0xd   : > { %s4983_s17 = smov (!%p343_p3, %s3205_s17), 127  ;;  %3785 = vmatpush1.bf16.msra.mxu0 %v3784_v17  ;;  %v3805_v46 = vpack.c.bf16 %v1344_v45, %v1343_v44  ;;  %v3808_v53 = vpack.c.bf16 %v1346_v52, %v1345_v51  ;;  %v1347_v58 = vld [vmem:[%s4975_s3 + $0x80] sm:$0xff]  ;;  %v1348_v59 = vld [vmem:[%s4975_s3 + $0x88] sm:$0xff]  ;;  %v1349_v0 = vld [vmem:[%s4975_s3 + $0x90] sm:$0xff] }
   0xe   : > { %s3209_s16 = sshll.u32 %s4983_s17, 3  ;;  %3786 = vmatprep.subr.bf16.mxu0 %v3917_v13  ;;  %v3811_v60 = vpack.c.bf16 %v1348_v59, %v1347_v58  ;;  %v1350_v1 = vld [vmem:[%s4975_s3 + $0x98] sm:$0xff]  ;;  %v1351_v4 = vld [vmem:[%s4975_s3 + $0xa0] sm:$0xff]  ;;  %v1352_v5 = vld [vmem:[%s4975_s3 + $0xa8] sm:$0xff]  ;;  %s3409_s26 = sshll.u32 %s4983_s17, 4 }
   0xf   : > { %s4022_s20 = scalar_lea.vmem %s4973_s1, %s3209_s16  ;;  %3883 = vmatpush1.bf16.msra.mxu1 %v3790_v19  ;;  %v3814_v2 = vpack.c.bf16 %v1350_v1, %v1349_v0  ;;  %v3817_v6 = vpack.c.bf16 %v1352_v5, %v1351_v4  ;;  %v1353_v9 = vld [vmem:[%s4975_s3 + $0xb0] sm:$0xff]  ;;  %v1354_v10 = vld [vmem:[%s4975_s3 + $0xb8] sm:$0xff]  ;;  %v1355_v14 = vld [vmem:[%s4975_s3 + $0xc0] sm:$0xff]  ;;  %s4350_s29 = scalar_lea.vmem %s4972_s0, %s3409_s26 }
  0x10   : > { %v361_v22 = vld [vmem:[%s4022_s20] sm:$0xff]  ;;  %3868 = vmatprep.subr.bf16.mxu1 %v3917_v13  ;;  %v362_v26 = vld [vmem:[%s4022_s20 + $0x8] sm:$0xff]  ;;  %v363_v28 = vld [vmem:[%s4022_s20 + $0x10] sm:$0xff]  ;;  %v3820_v11 = vpack.c.bf16 %v1354_v10, %v1353_v9 }
  0x11   : > { %3212 = vmatmul.mubr.msk.f32.vlgmr.msra.gmra.mrb[0].mxu0 %vm433_vm0, %v361_v22  ;;  %v364_v29 = vld [vmem:[%s4022_s20 + $0x18] sm:$0xff]  ;;  %v365_v33 = vld [vmem:[%s4022_s20 + $0x20] sm:$0xff]  ;;  %v366_v34 = vld [vmem:[%s4022_s20 + $0x28] sm:$0xff] }
  0x12   : > { %696 = vmatprep.mubr.f32.mxu0 %v3916_v7  ;;  %3788 = vmatpush1.bf16.msra.mxu0 %v3787_v18  ;;  %v367_v35 = vld [vmem:[%s4022_s20 + $0x30] sm:$0xff]  ;;  %v368_v36 = vld [vmem:[%s4022_s20 + $0x38] sm:$0xff]  ;;  %v369_v40 = vld [vmem:[%s4022_s20 + $0x40] sm:$0xff] }
  0x13   : > { %3789 = vmatprep.subr.bf16.mxu0 %v3917_v13  ;;  %3884 = vmatpush1.bf16.msra.mxu1 %v3793_v23  ;;  %v370_v41 = vld [vmem:[%s4022_s20 + $0x48] sm:$0xff]  ;;  %v371_v42 = vld [vmem:[%s4022_s20 + $0x50] sm:$0xff]  ;;  %v372_v43 = vld [vmem:[%s4022_s20 + $0x58] sm:$0xff] }
  0x14   : > { %3869 = vmatprep.subr.bf16.mxu1 %v3917_v13  ;;  %v373_v47 = vld [vmem:[%s4022_s20 + $0x60] sm:$0xff]  ;;  %v374_v48 = vld [vmem:[%s4022_s20 + $0x68] sm:$0xff]  ;;  %v375_v49 = vld [vmem:[%s4022_s20 + $0x70] sm:$0xff] }
  0x15   : > { %3213 = vmatmul.mubr.msk.f32.gmra.mrb[2].mxu0 %vm433_vm0, %v362_v26  ;;  %v376_v50 = vld [vmem:[%s4022_s20 + $0x78] sm:$0xff]  ;;  %v377_v54 = vld [vmem:[%s4022_s20 + $0x80] sm:$0xff]  ;;  %v378_v55 = vld [vmem:[%s4022_s20 + $0x88] sm:$0xff] }
  0x16   : > { %702 = vmatprep.mubr.f32.mxu0 %v3916_v7  ;;  %3791 = vmatpush1.bf16.msra.mxu0 %v3790_v19  ;;  %v379_v56 = vld [vmem:[%s4022_s20 + $0x90] sm:$0xff]  ;;  %v380_v57 = vld [vmem:[%s4022_s20 + $0x98] sm:$0xff]  ;;  %v381_v61 = vld [vmem:[%s4022_s20 + $0xa0] sm:$0xff] }
  0x17   : > { %3792 = vmatprep.subr.bf16.mxu0 %v3917_v13  ;;  %3885 = vmatpush1.bf16.msra.mxu1 %v3796_v27  ;;  %v382_v62 = vld [vmem:[%s4022_s20 + $0xa8] sm:$0xff]  ;;  %v383_v63 = vld [vmem:[%s4022_s20 + $0xb0] sm:$0xff]  ;;  %v384_v3 = vld [vmem:[%s4022_s20 + $0xb8] sm:$0xff] }
  0x18   : > { %3870 = vmatprep.subr.bf16.mxu1 %v3917_v13  ;;  %v385_v8 = vld [vmem:[%s4022_s20 + $0xc0] sm:$0xff]  ;;  %v386_v12 = vld [vmem:[%s4022_s20 + $0xc8] sm:$0xff]  ;;  %v387_v17 = vld [vmem:[%s4022_s20 + $0xd0] sm:$0xff] }
  0x19   : > { %3214 = vmatmul.mubr.msk.f32.gmra.mrb[4].mxu0 %vm433_vm0, %v363_v28  ;;  %v1356_v15 = vld [vmem:[%s4975_s3 + $0xc8] sm:$0xff]  ;;  %v1357_v18 = vld [vmem:[%s4975_s3 + $0xd0] sm:$0xff]  ;;  %v1358_v19 = vld [vmem:[%s4975_s3 + $0xd8] sm:$0xff] }
  0x1a   : > { %708 = vmatprep.mubr.f32.mxu0 %v3916_v7  ;;  %3794 = vmatpush1.bf16.msra.mxu0 %v3793_v23  ;;  %v3823_v16 = vpack.c.bf16 %v1356_v15, %v1355_v14  ;;  %v3826_v20 = vpack.c.bf16 %v1358_v19, %v1357_v18  ;;  %v388_v21 = vld [vmem:[%s4022_s20 + $0xd8] sm:$0xff]  ;;  %v1359_v22 = vld [vmem:[%s4975_s3 + $0xe0] sm:$0xff]  ;;  %v1360_v23 = vld [vmem:[%s4975_s3 + $0xe8] sm:$0xff] }
  0x1b   : > { %3795 = vmatprep.subr.bf16.mxu0 %v3917_v13  ;;  %3886 = vmatpush1.bf16.msra.mxu1 %v3799_v32  ;;  %v3829_v24 = vpack.c.bf16 %v1360_v23, %v1359_v22  ;;  %v389_v25 = vld [vmem:[%s4022_s20 + $0xe0] sm:$0xff]  ;;  %v1361_v26 = vld [vmem:[%s4975_s3 + $0xf0] sm:$0xff]  ;;  %v400_v38 = vld [vmem:[%s4022_s20 + $0x138] sm:$0xff] }
  0x1c   : > { %3871 = vmatprep.subr.bf16.mxu1 %v3917_v13  ;;  %v391_v30 = vld [vmem:[%s4022_s20 + $0xf0] sm:$0xff]  ;;  %v393_v31 = vld [vmem:[%s4022_s20 + $0x100] sm:$0xff]  ;;  %v406_v44 = vld [vmem:[%s4022_s20 + $0x168] sm:$0xff] }
  0x1d   : > { %3215 = vmatmul.mubr.msk.f32.gmra.mrb[6].mxu0 %vm433_vm0, %v364_v29  ;;  %v390_v29 = vld [vmem:[%s4022_s20 + $0xe8] sm:$0xff]  ;;  %v399_v37 = vld [vmem:[%s4022_s20 + $0x130] sm:$0xff]  ;;  %v413_v51 = vld [vmem:[%s4022_s20 + $0x1a0] sm:$0xff] }
  0x1e   : > { %714 = vmatprep.mubr.f32.mxu0 %v3916_v7  ;;  %3797 = vmatpush1.bf16.msra.mxu0 %v3796_v27  ;;  %v1362_v27 = vld [vmem:[%s4975_s3 + $0xf8] sm:$0xff]  ;;  %v407_v45 = vld [vmem:[%s4022_s20 + $0x170] sm:$0xff]  ;;  %v414_v52 = vld [vmem:[%s4022_s20 + $0x1a8] sm:$0xff] }
  0x1f   : > { %3798 = vmatprep.subr.bf16.mxu0 %v3917_v13  ;;  %3887 = vmatpush1.bf16.msra.mxu1 %v3802_v39  ;;  %v3832_v28 = vpack.c.bf16 %v1362_v27, %v1361_v26  ;;  %v416_v58 = vld [vmem:[%s4022_s20 + $0x1b8] sm:$0xff]  ;;  %v418_v0 = vld [vmem:[%s4022_s20 + $0x1c8] sm:$0xff]  ;;  %v421_v10 = vld [vmem:[%s4022_s20 + $0x1e0] sm:$0xff] }
  0x20   : > { %3872 = vmatprep.subr.bf16.mxu1 %v3917_v13  ;;  %v1089_v14 = vld [vmem:[%s4350_s29 + $0x70] sm:$0xff]  ;;  %v1092_v19 = vld [vmem:[%s4350_s29 + $0x88] sm:$0xff]  ;;  %v1094_v26 = vld [vmem:[%s4350_s29 + $0x98] sm:$0xff] }
  0x21   : > { %3216 = vmatmul.mubr.msk.f32.gmra.mrb[8].mxu0 %vm433_vm0, %v365_v33  ;;  %v395_v33 = vld [vmem:[%s4022_s20 + $0x110] sm:$0xff] }
  0x22   : > { %720 = vmatprep.mubr.f32.mxu0 %v3916_v7  ;;  %3800 = vmatpush1.bf16.msra.mxu0 %v3799_v32  ;;  %v394_v32 = vld [vmem:[%s4022_s20 + $0x108] sm:$0xff] }
  0x23   : > { %3801 = vmatprep.subr.bf16.mxu0 %v3917_v13  ;;  %3888 = vmatpush1.bf16.msra.mxu1 %v3805_v46 }
  0x24   : > { %3873 = vmatprep.subr.bf16.mxu1 %v3917_v13 }
  0x25   : > { %3217 = vmatmul.mubr.msk.f32.gmra.mrb[10].mxu0 %vm433_vm0, %v366_v34  ;;  %v396_v34 = vld [vmem:[%s4022_s20 + $0x118] sm:$0xff] }
  0x26   : > { %726 = vmatprep.mubr.f32.mxu0 %v3916_v7  ;;  %3803 = vmatpush1.bf16.msra.mxu0 %v3802_v39  ;;  %v401_v39 = vld [vmem:[%s4022_s20 + $0x140] sm:$0xff] }
  0x27   : > { %3804 = vmatprep.subr.bf16.mxu0 %v3917_v13  ;;  %3889 = vmatpush1.bf16.msra.mxu1 %v3808_v53 }
  0x28   : > { %3874 = vmatprep.subr.bf16.mxu1 %v3917_v13 }
  0x29   : > { %3218 = vmatmul.mubr.msk.f32.gmra.mrb[12].mxu0 %vm433_vm0, %v367_v35  ;;  %v397_v35 = vld [vmem:[%s4022_s20 + $0x120] sm:$0xff] }
  0x2a   : > { %732 = vmatprep.mubr.f32.mxu0 %v3916_v7  ;;  %3806 = vmatpush1.bf16.msra.mxu0 %v3805_v46  ;;  %v408_v46 = vld [vmem:[%s4022_s20 + $0x178] sm:$0xff] }
  0x2b   : > { %3807 = vmatprep.subr.bf16.mxu0 %v3917_v13  ;;  %3890 = vmatpush1.bf16.msra.mxu1 %v3811_v60 }
  0x2c   : > { %3875 = vmatprep.subr.bf16.mxu1 %v3917_v13 }
  0x2d   : > { %3219 = vmatmul.mubr.msk.f32.gmra.mrb[14].mxu0 %vm433_vm0, %v368_v36  ;;  %v398_v36 = vld [vmem:[%s4022_s20 + $0x128] sm:$0xff] }
  0x2e   : > { %738 = vmatprep.mubr.f32.mxu0 %v3916_v7  ;;  %3809 = vmatpush1.bf16.msra.mxu0 %v3808_v53 }
  0x2f   : > { %3810 = vmatprep.subr.bf16.mxu0 %v3917_v13  ;;  %3891 = vmatpush1.bf16.msra.mxu1 %v3814_v2 }
  0x30   : > { %3876 = vmatprep.subr.bf16.mxu1 %v3917_v13 }
  0x31   : > { %3220 = vmatmul.mubr.msk.f32.gmra.mrb[16].mxu0 %vm433_vm0, %v369_v40  ;;  %v402_v40 = vld [vmem:[%s4022_s20 + $0x148] sm:$0xff] }
  0x32   : > { %744 = vmatprep.mubr.f32.mxu0 %v3916_v7  ;;  %3812 = vmatpush1.bf16.msra.mxu0 %v3811_v60 }
  0x33   : > { %3813 = vmatprep.subr.bf16.mxu0 %v3917_v13  ;;  %3892 = vmatpush1.bf16.msra.mxu1 %v3817_v6 }
  0x34   : > { %3877 = vmatprep.subr.bf16.mxu1 %v3917_v13 }
  0x35   : > { %3221 = vmatmul.mubr.msk.f32.gmra.mrb[18].mxu0 %vm433_vm0, %v370_v41  ;;  %v403_v41 = vld [vmem:[%s4022_s20 + $0x150] sm:$0xff] }
  0x36   : > { %750 = vmatprep.mubr.f32.mxu0 %v3916_v7  ;;  %3815 = vmatpush1.bf16.msra.mxu0 %v3814_v2 }
  0x37   : > { %3816 = vmatprep.subr.bf16.mxu0 %v3917_v13  ;;  %3893 = vmatpush1.bf16.msra.mxu1 %v3820_v11 }
  0x38   : > { %3878 = vmatprep.subr.bf16.mxu1 %v3917_v13 }
  0x39   : > { %3222 = vmatmul.mubr.msk.f32.gmra.mrb[20].mxu0 %vm433_vm0, %v371_v42  ;;  %v404_v42 = vld [vmem:[%s4022_s20 + $0x158] sm:$0xff] }
  0x3a   : > { %756 = vmatprep.mubr.f32.mxu0 %v3916_v7  ;;  %3818 = vmatpush1.bf16.msra.mxu0 %v3817_v6  ;;  %v420_v6 = vld [vmem:[%s4022_s20 + $0x1d8] sm:$0xff] }
  0x3b   : > { %3819 = vmatprep.subr.bf16.mxu0 %v3917_v13  ;;  %3894 = vmatpush1.bf16.msra.mxu1 %v3823_v16 }
  0x3c   : > { %3879 = vmatprep.subr.bf16.mxu1 %v3917_v13 }
  0x3d   : > { %3223 = vmatmul.mubr.msk.f32.gmra.mrb[22].mxu0 %vm433_vm0, %v372_v43  ;;  %v405_v43 = vld [vmem:[%s4022_s20 + $0x160] sm:$0xff] }
  0x3e   : > { %762 = vmatprep.mubr.f32.mxu0 %v3916_v7  ;;  %3821 = vmatpush1.bf16.msra.mxu0 %v3820_v11  ;;  %v1090_v11 = vld [vmem:[%s4350_s29 + $0x78] sm:$0xff] }
  0x3f   : > { %3822 = vmatprep.subr.bf16.mxu0 %v3917_v13  ;;  %3895 = vmatpush1.bf16.msra.mxu1 %v3826_v20 }
  0x40   : > { %3880 = vmatprep.subr.bf16.mxu1 %v3917_v13 }
  0x41   : > { %3224 = vmatmul.mubr.msk.f32.gmra.mrb[24].mxu0 %vm433_vm0, %v373_v47  ;;  %v409_v47 = vld [vmem:[%s4022_s20 + $0x180] sm:$0xff] }
  0x42   : > { %768 = vmatprep.mubr.f32.mxu0 %v3916_v7  ;;  %3824 = vmatpush1.bf16.msra.mxu0 %v3823_v16 }
  0x43   : > { %3825 = vmatprep.subr.bf16.mxu0 %v3917_v13  ;;  %3896 = vmatpush1.bf16.msra.mxu1 %v3829_v24 }
  0x44   : > { %3881 = vmatprep.subr.bf16.mxu1 %v3917_v13 }
  0x45   : > { %3225 = vmatmul.mubr.msk.f32.gmra.mrb[26].mxu0 %vm433_vm0, %v374_v48  ;;  %v410_v48 = vld [vmem:[%s4022_s20 + $0x188] sm:$0xff] }
  0x46   : > { %774 = vmatprep.mubr.f32.mxu0 %v3916_v7  ;;  %3827 = vmatpush1.bf16.msra.mxu0 %v3826_v20 }
  0x47   : > { %3828 = vmatprep.subr.bf16.mxu0 %v3917_v13  ;;  %3897 = vmatpush1.bf16.msra.mxu1 %v3832_v28 }
  0x49   : > { %3226 = vmatmul.mubr.msk.f32.gmra.mrb[28].mxu0 %vm433_vm0, %v375_v49  ;;  %v411_v49 = vld [vmem:[%s4022_s20 + $0x190] sm:$0xff] }
  0x4a   : > { %780 = vmatprep.mubr.f32.mxu0 %v3916_v7  ;;  %3830 = vmatpush1.bf16.msra.mxu0 %v3829_v24  ;;  %v423_v24 = vld [vmem:[%s4022_s20 + $0x1f0] sm:$0xff] }
  0x4b   : > { %3831 = vmatprep.subr.bf16.mxu0 %v3917_v13  ;;  %v392_v13 = vld [vmem:[%s4022_s20 + $0xf8] sm:$0xff] }
  0x4d   : > { %3227 = vmatmul.mubr.msk.f32.gmra.mrb[30].mxu0 %vm433_vm0, %v376_v50  ;;  %v412_v50 = vld [vmem:[%s4022_s20 + $0x198] sm:$0xff] }
  0x4e   : > { %786 = vmatprep.mubr.f32.mxu0 %v3916_v7  ;;  %3833 = vmatpush1.bf16.msra.mxu0 %v3832_v28  ;;  %v1093_v28 = vld [vmem:[%s4350_s29 + $0x90] sm:$0xff] }
  0x51   : > { %3228 = vmatmul.mubr.msk.f32.gmra.mrb[32].mxu0 %vm433_vm0, %v377_v54 }
  0x52   : > { %792 = vmatprep.mubr.f32.mxu0 %v3916_v7 }
  0x55   : > { %3229 = vmatmul.mubr.msk.f32.gmra.mrb[34].mxu0 %vm433_vm0, %v378_v55  ;;  %v415_v55 = vld [vmem:[%s4022_s20 + $0x1b0] sm:$0xff] }
  0x56   : > { %798 = vmatprep.mubr.f32.mxu0 %v3916_v7 }
  0x59   : > { %3230 = vmatmul.mubr.msk.f32.gmra.mrb[36].mxu0 %vm433_vm0, %v379_v56 }
  0x5a   : > { %804 = vmatprep.mubr.f32.mxu0 %v3916_v7 }
  0x5d   : > { %3231 = vmatmul.mubr.msk.f32.gmra.mrb[38].mxu0 %vm433_vm0, %v380_v57 }
  0x5e   : > { %810 = vmatprep.mubr.f32.mxu0 %v3916_v7 }
  0x61   : > { %3232 = vmatmul.mubr.msk.f32.gmra.mrb[40].mxu0 %vm433_vm0, %v381_v61  ;;  %v417_v61 = vld [vmem:[%s4022_s20 + $0x1c0] sm:$0xff] }
  0x62   : > { %816 = vmatprep.mubr.f32.mxu0 %v3916_v7 }
  0x65   : > { %3233 = vmatmul.mubr.msk.f32.gmra.mrb[42].mxu0 %vm433_vm0, %v382_v62 }
  0x66   : > { %822 = vmatprep.mubr.f32.mxu0 %v3916_v7 }
  0x69   : > { %3234 = vmatmul.mubr.msk.f32.gmra.mrb[44].mxu0 %vm433_vm0, %v383_v63 }
  0x6a   : > { %828 = vmatprep.mubr.f32.mxu0 %v3916_v7 }
  0x6d   : > { %3235 = vmatmul.mubr.msk.f32.gmra.mrb[46].mxu0 %vm433_vm0, %v384_v3  ;;  %v419_v3 = vld [vmem:[%s4022_s20 + $0x1d0] sm:$0xff] }
  0x6e   : > { %834 = vmatprep.mubr.f32.mxu0 %v3916_v7 }
  0x71   : > { %3236 = vmatmul.mubr.msk.f32.gmra.mrb[48].mxu0 %vm433_vm0, %v385_v8 }
  0x72   : > { %840 = vmatprep.mubr.f32.mxu0 %v3916_v7 }
  0x75   : > { %3237 = vmatmul.mubr.msk.f32.gmra.mrb[50].mxu0 %vm433_vm0, %v386_v12 }
  0x76   : > { %846 = vmatprep.mubr.f32.mxu0 %v3916_v7 }
  0x79   : > { %3238 = vmatmul.mubr.msk.f32.gmra.mrb[52].mxu0 %vm433_vm0, %v387_v17  ;;  %v422_v17 = vld [vmem:[%s4022_s20 + $0x1e8] sm:$0xff] }
  0x7a   : > { %852 = vmatprep.mubr.f32.mxu0 %v3916_v7 }
  0x7d   : > { %3239 = vmatmul.mubr.msk.f32.gmra.mrb[54].mxu0 %vm433_vm0, %v388_v21  ;;  %v1091_v21 = vld [vmem:[%s4350_s29 + $0x80] sm:$0xff] }
  0x7e   : > { %858 = vmatprep.mubr.f32.mxu0 %v3916_v7 }
  0x81   : > { %3240 = vmatmul.mubr.msk.f32.gmra.mrb[56].mxu0 %vm433_vm0, %v389_v25 }
  0x82   : > { %864 = vmatprep.mubr.f32.mxu0 %v3916_v7 }
  0x85   : > { %3241 = vmatmul.mubr.msk.f32.gmra.mrb[58].mxu0 %vm433_vm0, %v390_v29  ;;  %v1076_v29 = vld [vmem:[%s4350_s29 + $0x8] sm:$0xff] }
  0x86   : > { %870 = vmatprep.mubr.f32.mxu0 %v3916_v7 }
  0x89   : > { %3242 = vmatmul.mubr.msk.f32.gmra.mrb[60].mxu0 %vm433_vm0, %v391_v30 }
  0x8a   : > { %876 = vmatprep.mubr.f32.mxu0 %v3916_v7 }
  0x8d   : > { %3243 = vmatmul.mubr.msk.f32.gmra.mrb[62].mxu0 %vm433_vm0, %v392_v13 }
  0x8e   : > { %882 = vmatprep.mubr.f32.mxu0 %v3916_v7 }
  0x91   : > { %3244 = vmatmul.mubr.msk.f32.gmra.mrb[64].mxu0 %vm433_vm0, %v393_v31  ;;  %v424_v31 = vld [vmem:[%s4022_s20 + $0x1f8] sm:$0xff] }
  0x92   : > { %888 = vmatprep.mubr.f32.mxu0 %v3916_v7 }
  0x95   : > { %3245 = vmatmul.mubr.msk.f32.gmra.mrb[66].mxu0 %vm433_vm0, %v394_v32 }
  0x96   : > { %894 = vmatprep.mubr.f32.mxu0 %v3916_v7 }
  0x99   : > { %3246 = vmatmul.mubr.msk.f32.gmra.mrb[68].mxu0 %vm433_vm0, %v395_v33  ;;  %v1096_v33 = vld [vmem:[%s4350_s29 + $0xa8] sm:$0xff] }
  0x9a   : > { %900 = vmatprep.mubr.f32.mxu0 %v3916_v7 }
  0x9d   : > { %3247 = vmatmul.mubr.msk.f32.gmra.mrb[70].mxu0 %vm433_vm0, %v396_v34  ;;  %v1075_v34 = vld [vmem:[%s4350_s29] sm:$0xff] }
  0x9e   : > { %906 = vmatprep.mubr.f32.mxu0 %v3916_v7 }
  0xa1   : > { %3248 = vmatmul.mubr.msk.f32.gmra.mrb[72].mxu0 %vm433_vm0, %v397_v35 }
  0xa2   : > { %912 = vmatprep.mubr.f32.mxu0 %v3916_v7 }
  0xa5   : > { %3249 = vmatmul.mubr.msk.f32.gmra.mrb[74].mxu0 %vm433_vm0, %v398_v36 }
  0xa6   : > { %918 = vmatprep.mubr.f32.mxu0 %v3916_v7 }
  0xa9   : > { %3250 = vmatmul.mubr.msk.f32.gmra.mrb[76].mxu0 %vm433_vm0, %v399_v37  ;;  %v1095_v37 = vld [vmem:[%s4350_s29 + $0xa0] sm:$0xff] }
  0xaa   : > { %924 = vmatprep.mubr.f32.mxu0 %v3916_v7 }
  0xad   : > { %3251 = vmatmul.mubr.msk.f32.gmra.mrb[78].mxu0 %vm433_vm0, %v400_v38  ;;  %v1078_v38 = vld [vmem:[%s4350_s29 + $0x18] sm:$0xff] }
  0xae   : > { %930 = vmatprep.mubr.f32.mxu0 %v3916_v7 }
  0xb1   : > { %3252 = vmatmul.mubr.msk.f32.gmra.mrb[80].mxu0 %vm433_vm0, %v401_v39 }
  0xb2   : > { %936 = vmatprep.mubr.f32.mxu0 %v3916_v7 }
  0xb5   : > { %3253 = vmatmul.mubr.msk.f32.gmra.mrb[82].mxu0 %vm433_vm0, %v402_v40 }
  0xb6   : > { %942 = vmatprep.mubr.f32.mxu0 %v3916_v7 }
  0xb9   : > { %3254 = vmatmul.mubr.msk.f32.gmra.mrb[84].mxu0 %vm433_vm0, %v403_v41 }
  0xba   : > { %948 = vmatprep.mubr.f32.mxu0 %v3916_v7 }
  0xbd   : > { %3255 = vmatmul.mubr.msk.f32.gmra.mrb[86].mxu0 %vm433_vm0, %v404_v42  ;;  %v1098_v42 = vld [vmem:[%s4350_s29 + $0xb8] sm:$0xff] }
  0xbe   : > { %954 = vmatprep.mubr.f32.mxu0 %v3916_v7 }
  0xc1   : > { %3256 = vmatmul.mubr.msk.f32.gmra.mrb[88].mxu0 %vm433_vm0, %v405_v43  ;;  %v1077_v43 = vld [vmem:[%s4350_s29 + $0x10] sm:$0xff] }
  0xc2   : > { %960 = vmatprep.mubr.f32.mxu0 %v3916_v7 }
  0xc5   : > { %3257 = vmatmul.mubr.msk.f32.gmra.mrb[90].mxu0 %vm433_vm0, %v406_v44 }
  0xc6   : > { %966 = vmatprep.mubr.f32.mxu0 %v3916_v7 }
  0xc9   : > { %3258 = vmatmul.mubr.msk.f32.gmra.mrb[92].mxu0 %vm433_vm0, %v407_v45 }
  0xca   : > { %972 = vmatprep.mubr.f32.mxu0 %v3916_v7 }
  0xcd   : > { %3259 = vmatmul.mubr.msk.f32.gmra.mrb[94].mxu0 %vm433_vm0, %v408_v46  ;;  %v1097_v46 = vld [vmem:[%s4350_s29 + $0xb0] sm:$0xff] }
  0xce   : > { %978 = vmatprep.mubr.f32.mxu0 %v3916_v7 }
  0xd1   : > { %3260 = vmatmul.mubr.msk.f32.gmra.mrb[96].mxu0 %vm433_vm0, %v409_v47  ;;  %v1080_v47 = vld [vmem:[%s4350_s29 + $0x28] sm:$0xff] }
  0xd2   : > { %984 = vmatprep.mubr.f32.mxu0 %v3916_v7 }
  0xd5   : > { %3261 = vmatmul.mubr.msk.f32.gmra.mrb[98].mxu0 %vm433_vm0, %v410_v48 }
  0xd6   : > { %990 = vmatprep.mubr.f32.mxu0 %v3916_v7 }
  0xd9   : > { %3262 = vmatmul.mubr.msk.f32.gmra.mrb[100].mxu0 %vm433_vm0, %v411_v49 }
  0xda   : > { %996 = vmatprep.mubr.f32.mxu0 %v3916_v7 }
  0xdd   : > { %3263 = vmatmul.mubr.msk.f32.gmra.mrb[102].mxu0 %vm433_vm0, %v412_v50 }
  0xde   : > { %1002 = vmatprep.mubr.f32.mxu0 %v3916_v7 }
  0xe1   : > { %3264 = vmatmul.mubr.msk.f32.gmra.mrb[104].mxu0 %vm433_vm0, %v413_v51 }
  0xe2   : > { %1008 = vmatprep.mubr.f32.mxu0 %v3916_v7 }
  0xe4   : > { %v4299_v53 = vpop.f32.mrb[0].mxu0 }
  0xe5   : > { %v4301_v54 = vpop.f32.mrb[1].mxu0  ;;  %3265 = vmatmul.mubr.msk.f32.gmra.mrb[106].mxu0 %vm433_vm0, %v414_v52  ;;  %v1100_v52 = vld [vmem:[%s4350_s29 + $0xc8] sm:$0xff] }
  0xe6   : > { %1014 = vmatprep.mubr.f32.mxu0 %v3916_v7  ;;  %v1204_v35 = vmul.f32 %v1076_v29, %v4301_v54  ;;  %v1105_v29 = vld [vmem:[%s4350_s29 + $0xf0] sm:$0xff] }
  0xe8   : > { %v4306_v56 = vpop.f32.mrb[2].mxu0 }
  0xe9   : > { %v4308_v57 = vpop.f32.mrb[3].mxu0  ;;  %3266 = vmatmul.mubr.msk.f32.gmra.mrb[108].mxu0 %vm433_vm0, %v415_v55  ;;  %v1205_v50 = vmul.f32 %v1077_v43, %v4306_v56 }
  0xea   : > { %1020 = vmatprep.mubr.f32.mxu0 %v3916_v7  ;;  %v1206_v44 = vmul.f32 %v1078_v38, %v4308_v57  ;;  %v1099_v57 = vld [vmem:[%s4350_s29 + $0xc0] sm:$0xff] }
  0xec   : > { %v4313_v59 = vpop.f32.mrb[4].mxu0 }
  0xed   : > { %v4315_v60 = vpop.f32.mrb[5].mxu0  ;;  %3267 = vmatmul.mubr.msk.f32.gmra.mrb[110].mxu0 %vm433_vm0, %v416_v58  ;;  %v1082_v58 = vld [vmem:[%s4350_s29 + $0x38] sm:$0xff] }
  0xee   : > { %1026 = vmatprep.mubr.f32.mxu0 %v3916_v7  ;;  %v1208_v54 = vmul.f32 %v1080_v47, %v4315_v60 }
  0xf0   : > { %v4320_v62 = vpop.f32.mrb[6].mxu0 }
  0xf1   : > { %v4322_v63 = vpop.f32.mrb[7].mxu0  ;;  %3268 = vmatmul.mubr.msk.f32.gmra.mrb[112].mxu0 %vm433_vm0, %v417_v61 }
  0xf2   : > { %1032 = vmatprep.mubr.f32.mxu0 %v3916_v7  ;;  %v1210_v60 = vmul.f32 %v1082_v58, %v4322_v63  ;;  %v1115_v58 = vld [vmem:[%s4350_s29 + $0x140] sm:$0xff] }
  0xf4   : > { %v4327_v1 = vpop.f32.mrb[8].mxu0 }
  0xf5   : > { %v4329_v2 = vpop.f32.mrb[9].mxu0  ;;  %3269 = vmatmul.mubr.msk.f32.gmra.mrb[114].mxu0 %vm433_vm0, %v418_v0 }
  0xf6   : > { %1038 = vmatprep.mubr.f32.mxu0 %v3916_v7 }
  0xf8   : > { %v4334_v4 = vpop.f32.mrb[10].mxu0 }
  0xf9   : > { %v4336_v5 = vpop.f32.mrb[11].mxu0  ;;  %3270 = vmatmul.mubr.msk.f32.gmra.mrb[116].mxu0 %vm433_vm0, %v419_v3 }
  0xfa   : > { %1044 = vmatprep.mubr.f32.mxu0 %v3916_v7 }
  0xfc   : > { %v4342_v8 = vpop.f32.mrb[12].mxu0 }
  0xfd   : > { %v4344_v9 = vpop.f32.mrb[13].mxu0  ;;  %3271 = vmatmul.mubr.msk.f32.gmra.mrb[118].mxu0 %vm433_vm0, %v420_v6  ;;  %v1102_v6 = vld [vmem:[%s4350_s29 + $0xd8] sm:$0xff] }
  0xfe   : > { %1050 = vmatprep.mubr.f32.mxu0 %v3916_v7 }
 0x100   : > { %v734_v12 = vpop.f32.mrb[14].mxu0 }
 0x101   : > { %v736_v15 = vpop.f32.mrb[15].mxu0  ;;  %3272 = vmatmul.mubr.msk.f32.gmra.mrb[120].mxu0 %vm433_vm0, %v421_v10  ;;  %v1217_v18 = vmul.f32 %v1089_v14, %v734_v12  ;;  %v1081_v10 = vld [vmem:[%s4350_s29 + $0x30] sm:$0xff]  ;;  %v1084_v14 = vld [vmem:[%s4350_s29 + $0x48] sm:$0xff] }
 0x102   : > { %1056 = vmatprep.mubr.f32.mxu0 %v3916_v7  ;;  %v1218_v16 = vmul.f32 %v1090_v11, %v736_v15  ;;  %v1101_v12 = vld [vmem:[%s4350_s29 + $0xd0] sm:$0xff]  ;;  %v1212_v63 = vmul.f32 %v1084_v14, %v4329_v2  ;;  %v1120_v14 = vld [vmem:[%s4350_s29 + $0x168] sm:$0xff] }
 0x104   : > { %v740_v20 = vpop.f32.mrb[16].mxu0  ;;  %1469 = vmatprep.mubr.f32.mxu1 %v1218_v16 }
 0x105   : > { %v742_v22 = vpop.f32.mrb[17].mxu0  ;;  %3273 = vmatmul.mubr.msk.f32.gmra.mrb[122].mxu0 %vm433_vm0, %v422_v17  ;;  %1470 = vmatmul.mubr.f32.vlgmr.msra.gmra.mrb[0].mxu1 %v1217_v18  ;;  %v1219_v25 = vmul.f32 %v1091_v21, %v740_v20  ;;  %v1104_v18 = vld [vmem:[%s4350_s29 + $0xe8] sm:$0xff]  ;;  %v1103_v21 = vld [vmem:[%s4350_s29 + $0xe0] sm:$0xff] }
 0x106   : > { %v1220_v23 = vmul.f32 %v1092_v19, %v742_v22  ;;  %1062 = vmatprep.mubr.f32.mxu0 %v3916_v7  ;;  %v1083_v19 = vld [vmem:[%s4350_s29 + $0x40] sm:$0xff]  ;;  %v1086_v22 = vld [vmem:[%s4350_s29 + $0x58] sm:$0xff] }
 0x107   : > { %v1214_v2 = vmul.f32 %v1086_v22, %v4336_v5 }
 0x108   : > { %v746_v27 = vpop.f32.mrb[18].mxu0  ;;  %1474 = vmatprep.mubr.f32.mxu1 %v1220_v23 }
 0x109   : > { %v748_v30 = vpop.f32.mrb[19].mxu0  ;;  %3274 = vmatmul.mubr.msk.f32.gmra.mrb[124].mxu0 %vm433_vm0, %v423_v24  ;;  %1475 = vmatmul.mubr.f32.gmra.mrb[2].mxu1 %v1219_v25  ;;  %v1221_v32 = vmul.f32 %v1093_v28, %v746_v27  ;;  %v1085_v27 = vld [vmem:[%s4350_s29 + $0x50] sm:$0xff] }
 0x10a   : > { %v1222_v13 = vmul.f32 %v1094_v26, %v748_v30  ;;  %1068 = vmatprep.mubr.f32.mxu0 %v3916_v7  ;;  %v1203_v7 = vmul.f32 %v1075_v34, %v4299_v53  ;;  %v1079_v53 = vld [vmem:[%s4350_s29 + $0x20] sm:$0xff]  ;;  %v1106_v26 = vld [vmem:[%s4350_s29 + $0xf8] sm:$0xff]  ;;  %v1088_v30 = vld [vmem:[%s4350_s29 + $0x68] sm:$0xff] }
 0x10b   : > { %v1207_v56 = vmul.f32 %v1079_v53, %v4313_v59  ;;  %v1209_v59 = vmul.f32 %v1081_v10, %v4320_v62  ;;  %v1211_v62 = vmul.f32 %v1083_v19, %v4327_v1  ;;  %v1213_v1 = vmul.f32 %v1085_v27, %v4334_v4  ;;  %v1087_v34 = vld [vmem:[%s4350_s29 + $0x60] sm:$0xff]  ;;  %v1110_v4 = vld [vmem:[%s4350_s29 + $0x118] sm:$0xff]  ;;  %v1117_v10 = vld [vmem:[%s4350_s29 + $0x150] sm:$0xff] }
 0x10c   : > { %v752_v36 = vpop.f32.mrb[20].mxu0  ;;  %1479 = vmatprep.mubr.f32.mxu1 %v1222_v13  ;;  %v1122_v19 = vld [vmem:[%s4350_s29 + $0x178] sm:$0xff] }
 0x10d   : > { %v754_v39 = vpop.f32.mrb[21].mxu0  ;;  %3275 = vmatmul.mubr.msk.f32.gmra.mrb[126].mxu0 %vm433_vm0, %v424_v31  ;;  %1480 = vmatmul.mubr.f32.gmra.mrb[4].mxu1 %v1221_v32  ;;  %v1223_v41 = vmul.f32 %v1095_v37, %v752_v36  ;;  %v1107_v36 = vld [vmem:[%s4350_s29 + $0x100] sm:$0xff] }
 0x10e   : > { %v1224_v40 = vmul.f32 %v1096_v33, %v754_v39  ;;  %1434 = vmatprep.mubr.f32.mxu0 %v1204_v35  ;;  %v1108_v33 = vld [vmem:[%s4350_s29 + $0x108] sm:$0xff]  ;;  %v1216_v35 = vmul.f32 %v1088_v30, %v4344_v9  ;;  %v1215_v39 = vmul.f32 %v1087_v34, %v4342_v8  ;;  %v1125_v30 = vld [vmem:[%s4350_s29 + $0x190] sm:$0xff]  ;;  %v1127_v34 = vld [vmem:[%s4350_s29 + $0x1a0] sm:$0xff] }
 0x110   : > { %v758_v45 = vpop.f32.mrb[22].mxu0  ;;  %1484 = vmatprep.mubr.f32.mxu1 %v1224_v40 }
 0x111   : > { %v760_v48 = vpop.f32.mrb[23].mxu0  ;;  %1435 = vmatmul.mubr.f32.vlgmr.msra.gmra.mrb[128].mxu0 %v1203_v7  ;;  %1485 = vmatmul.mubr.f32.gmra.mrb[6].mxu1 %v1223_v41  ;;  %v1225_v51 = vmul.f32 %v1097_v46, %v758_v45  ;;  %v1109_v41 = vld [vmem:[%s4350_s29 + $0x110] sm:$0xff]  ;;  %v1111_v46 = vld [vmem:[%s4350_s29 + $0x120] sm:$0xff] }
 0x112   : > { %v1226_v49 = vmul.f32 %v1098_v42, %v760_v48  ;;  %1439 = vmatprep.mubr.f32.mxu0 %v1206_v44  ;;  %v1112_v44 = vld [vmem:[%s4350_s29 + $0x128] sm:$0xff] }
 0x114   : > { %v764_v55 = vpop.f32.mrb[24].mxu0  ;;  %1489 = vmatprep.mubr.f32.mxu1 %v1226_v49  ;;  %v1114_v49 = vld [vmem:[%s4350_s29 + $0x138] sm:$0xff] }
 0x115   : > { %v766_v61 = vpop.f32.mrb[25].mxu0  ;;  %1440 = vmatmul.mubr.f32.gmra.mrb[130].mxu0 %v1205_v50  ;;  %1490 = vmatmul.mubr.f32.gmra.mrb[8].mxu1 %v1225_v51  ;;  %v1227_v3 = vmul.f32 %v1099_v57, %v764_v55  ;;  %v1113_v51 = vld [vmem:[%s4350_s29 + $0x130] sm:$0xff]  ;;  %v1116_v55 = vld [vmem:[%s4350_s29 + $0x148] sm:$0xff] }
 0x116   : > { %v1228_v0 = vmul.f32 %v1100_v52, %v766_v61  ;;  %1444 = vmatprep.mubr.f32.mxu0 %v1208_v54 }
 0x118   : > { %v770_v11 = vpop.f32.mrb[26].mxu0  ;;  %1494 = vmatprep.mubr.f32.mxu1 %v1228_v0 }
 0x119   : > { %v772_v15 = vpop.f32.mrb[27].mxu0  ;;  %1445 = vmatmul.mubr.f32.gmra.mrb[132].mxu0 %v1207_v56  ;;  %1495 = vmatmul.mubr.f32.gmra.mrb[10].mxu1 %v1227_v3  ;;  %v1229_v17 = vmul.f32 %v1101_v12, %v770_v11  ;;  %v1118_v3 = vld [vmem:[%s4350_s29 + $0x158] sm:$0xff] }
 0x11a   : > { %v1230_v16 = vmul.f32 %v1102_v6, %v772_v15  ;;  %1449 = vmatprep.mubr.f32.mxu0 %v1210_v60 }
 0x11c   : > { %v776_v20 = vpop.f32.mrb[28].mxu0  ;;  %1499 = vmatprep.mubr.f32.mxu1 %v1230_v16  ;;  %v1119_v16 = vld [vmem:[%s4350_s29 + $0x160] sm:$0xff] }
 0x11d   : > { %v778_v23 = vpop.f32.mrb[29].mxu0  ;;  %1450 = vmatmul.mubr.f32.gmra.mrb[134].mxu0 %v1209_v59  ;;  %1500 = vmatmul.mubr.f32.gmra.mrb[12].mxu1 %v1229_v17  ;;  %v1231_v25 = vmul.f32 %v1103_v21, %v776_v20  ;;  %v1121_v20 = vld [vmem:[%s4350_s29 + $0x170] sm:$0xff] }
 0x11e   : > { %v1232_v24 = vmul.f32 %v1104_v18, %v778_v23  ;;  %1454 = vmatprep.mubr.f32.mxu0 %v1212_v63 }
 0x120   : > { %v782_v28 = vpop.f32.mrb[30].mxu0  ;;  %1504 = vmatprep.mubr.f32.mxu1 %v1232_v24  ;;  %v1124_v24 = vld [vmem:[%s4350_s29 + $0x188] sm:$0xff] }
 0x121   : > { %v784_v13 = vpop.f32.mrb[31].mxu0  ;;  %1455 = vmatmul.mubr.f32.gmra.mrb[136].mxu0 %v1211_v62  ;;  %1505 = vmatmul.mubr.f32.gmra.mrb[14].mxu1 %v1231_v25  ;;  %v1233_v32 = vmul.f32 %v1105_v29, %v782_v28  ;;  %v1123_v25 = vld [vmem:[%s4350_s29 + $0x180] sm:$0xff]  ;;  %v1126_v28 = vld [vmem:[%s4350_s29 + $0x198] sm:$0xff] }
 0x122   : > { %v1234_v31 = vmul.f32 %v1106_v26, %v784_v13  ;;  %1459 = vmatprep.mubr.f32.mxu0 %v1214_v2 }
 0x124   : > { %v788_v5 = vpop.f32.mrb[32].mxu0  ;;  %1509 = vmatprep.mubr.f32.mxu1 %v1234_v31 }
 0x125   : > { %v790_v37 = vpop.f32.mrb[33].mxu0  ;;  %1460 = vmatmul.mubr.f32.gmra.mrb[138].mxu0 %v1213_v1  ;;  %1510 = vmatmul.mubr.f32.gmra.mrb[16].mxu1 %v1233_v32  ;;  %v1235_v40 = vmul.f32 %v1107_v36, %v788_v5  ;;  %v1128_v32 = vld [vmem:[%s4350_s29 + $0x1a8] sm:$0xff] }
 0x126   : > { %v1236_v38 = vmul.f32 %v1108_v33, %v790_v37  ;;  %1464 = vmatprep.mubr.f32.mxu0 %v1216_v35  ;;  %v1130_v37 = vld [vmem:[%s4350_s29 + $0x1b8] sm:$0xff] }
 0x128   : > { %v794_v7 = vpop.f32.mrb[34].mxu0  ;;  %1514 = vmatprep.mubr.f32.mxu1 %v1236_v38 }
 0x129   : > { %v796_v9 = vpop.f32.mrb[35].mxu0  ;;  %1465 = vmatmul.mubr.f32.gmra.mrb[140].mxu0 %v1215_v39  ;;  %1515 = vmatmul.mubr.f32.gmra.mrb[18].mxu1 %v1235_v40  ;;  %v1237_v43 = vmul.f32 %v1109_v41, %v794_v7  ;;  %v1129_v39 = vld [vmem:[%s4350_s29 + $0x1b0] sm:$0xff]  ;;  %v1132_v41 = vld [vmem:[%s4350_s29 + $0x1c8] sm:$0xff] }
 0x12a   : > { %v1238_v42 = vmul.f32 %v1110_v4, %v796_v9 }
 0x12c   : > { %v800_v45 = vpop.f32.mrb[36].mxu0  ;;  %1519 = vmatprep.mubr.f32.mxu1 %v1238_v42  ;;  %v1131_v42 = vld [vmem:[%s4350_s29 + $0x1c0] sm:$0xff] }
 0x12d   : > { %v802_v47 = vpop.f32.mrb[37].mxu0  ;;  %1520 = vmatmul.mubr.f32.gmra.mrb[20].mxu1 %v1237_v43  ;;  %v1239_v48 = vmul.f32 %v1111_v46, %v800_v45  ;;  %v1134_v46 = vld [vmem:[%s4350_s29 + $0x1d8] sm:$0xff] }
 0x12e   : > { %v1240_v8 = vmul.f32 %v1112_v44, %v802_v47 }
 0x130   : > { %v806_v50 = vpop.f32.mrb[38].mxu0  ;;  %1524 = vmatprep.mubr.f32.mxu1 %v1240_v8  ;;  %v1133_v8 = vld [vmem:[%s4350_s29 + $0x1d0] sm:$0xff] }
 0x131   : > { %v808_v52 = vpop.f32.mrb[39].mxu0  ;;  %1525 = vmatmul.mubr.f32.gmra.mrb[22].mxu1 %v1239_v48  ;;  %v1241_v54 = vmul.f32 %v1113_v51, %v806_v50  ;;  %v1819_v50 = vld [vmem:[%s4977_s5] sm:$0xff]  ;;  %v1820_v51 = vld [vmem:[%s4977_s5 + $0x8] sm:$0xff] }
 0x132   : > { %v1242_v53 = vmul.f32 %v1114_v49, %v808_v52 }
 0x134   : > { %v812_v57 = vpop.f32.mrb[40].mxu0  ;;  %1529 = vmatprep.mubr.f32.mxu1 %v1242_v53  ;;  %v1136_v53 = vld [vmem:[%s4350_s29 + $0x1e8] sm:$0xff] }
 0x135   : > { %v814_v61 = vpop.f32.mrb[41].mxu0  ;;  %1530 = vmatmul.mubr.f32.gmra.mrb[24].mxu1 %v1241_v54  ;;  %v1243_v56 = vmul.f32 %v1115_v58, %v812_v57  ;;  %v3834_v54 = vpack.c.bf16 %v1820_v51, %v1819_v50  ;;  %v1135_v57 = vld [vmem:[%s4350_s29 + $0x1e0] sm:$0xff] }
 0x136   : > { %v1244_v0 = vmul.f32 %v1116_v55, %v814_v61 }
 0x137   : > { %3835 = vmatprep.subr.bf16.mxu0 %v3834_v54 }
 0x138   : > { %v818_v6 = vpop.f32.mrb[42].mxu0  ;;  %1534 = vmatprep.mubr.f32.mxu1 %v1244_v0  ;;  %3837 = vmatpush3.bf16.msra.mxu0 %v3834_v54  ;;  %v1821_v0 = vld [vmem:[%s4977_s5 + $0x10] sm:$0xff] }
 0x139   : > { %v820_v60 = vpop.f32.mrb[43].mxu0  ;;  %1535 = vmatmul.mubr.f32.gmra.mrb[26].mxu1 %v1243_v56  ;;  %v1245_v12 = vmul.f32 %v1117_v10, %v818_v6  ;;  %v1822_v56 = vld [vmem:[%s4977_s5 + $0x18] sm:$0xff] }
 0x13a   : > { %v1246_v11 = vmul.f32 %v1118_v3, %v820_v60  ;;  %v1138_v6 = vld [vmem:[%s4350_s29 + $0x1f8] sm:$0xff]  ;;  %v3838_v10 = vpack.c.bf16 %v1822_v56, %v1821_v0  ;;  %v1156_v0 = vld [vmem:[%s4350_s29 + $0x288] sm:$0xff] }
 0x13c   : > { %v824_v15 = vpop.f32.mrb[44].mxu0  ;;  %1539 = vmatprep.mubr.f32.mxu1 %v1246_v11  ;;  %v1137_v11 = vld [vmem:[%s4350_s29 + $0x1f0] sm:$0xff]  ;;  %3839 = vmatprep.subr.bf16.mxu0 %v3838_v10 }
 0x13d   : > { %v826_v59 = vpop.f32.mrb[45].mxu0  ;;  %1540 = vmatmul.mubr.f32.gmra.mrb[28].mxu1 %v1245_v12  ;;  %v1247_v18 = vmul.f32 %v1119_v16, %v824_v15  ;;  %3841 = vmatpush3.bf16.msra.mxu0 %v3838_v10  ;;  %v1823_v15 = vld [vmem:[%s4977_s5 + $0x20] sm:$0xff]  ;;  %v1824_v16 = vld [vmem:[%s4977_s5 + $0x28] sm:$0xff] }
 0x13e   : > { %v1248_v17 = vmul.f32 %v1120_v14, %v826_v59 }
 0x140   : > { %v830_v63 = vpop.f32.mrb[46].mxu0  ;;  %1544 = vmatprep.mubr.f32.mxu1 %v1248_v17  ;;  %v1140_v17 = vld [vmem:[%s4350_s29 + $0x208] sm:$0xff] }
 0x141   : > { %v832_v21 = vpop.f32.mrb[47].mxu0  ;;  %1545 = vmatmul.mubr.f32.gmra.mrb[30].mxu1 %v1247_v18  ;;  %v1249_v23 = vmul.f32 %v1121_v20, %v830_v63  ;;  %v3842_v18 = vpack.c.bf16 %v1824_v16, %v1823_v15  ;;  %v1139_v63 = vld [vmem:[%s4350_s29 + $0x200] sm:$0xff] }
 0x142   : > { %v1250_v22 = vmul.f32 %v1122_v19, %v832_v21 }
 0x143   : > { %3843 = vmatprep.subr.bf16.mxu0 %v3842_v18 }
 0x144   : > { %v836_v62 = vpop.f32.mrb[48].mxu0  ;;  %1549 = vmatprep.mubr.f32.mxu1 %v1250_v22  ;;  %3845 = vmatpush3.bf16.msra.mxu0 %v3842_v18  ;;  %v1825_v22 = vld [vmem:[%s4977_s5 + $0x30] sm:$0xff] }
 0x145   : > { %v838_v26 = vpop.f32.mrb[49].mxu0  ;;  %1550 = vmatmul.mubr.f32.gmra.mrb[32].mxu1 %v1249_v23  ;;  %v1251_v2 = vmul.f32 %v1123_v25, %v836_v62  ;;  %v1826_v23 = vld [vmem:[%s4977_s5 + $0x38] sm:$0xff] }
 0x146   : > { %v1252_v27 = vmul.f32 %v1124_v24, %v838_v26  ;;  %v1142_v62 = vld [vmem:[%s4350_s29 + $0x218] sm:$0xff]  ;;  %v3846_v25 = vpack.c.bf16 %v1826_v23, %v1825_v22 }
 0x147   : > { %v1162_v22 = vld [vmem:[%s4350_s29 + $0x2b8] sm:$0xff] }
 0x148   : > { %v842_v29 = vpop.f32.mrb[50].mxu0  ;;  %1554 = vmatprep.mubr.f32.mxu1 %v1252_v27  ;;  %v1141_v27 = vld [vmem:[%s4350_s29 + $0x210] sm:$0xff]  ;;  %3847 = vmatprep.subr.bf16.mxu0 %v3846_v25 }
 0x149   : > { %v844_v13 = vpop.f32.mrb[51].mxu0  ;;  %1555 = vmatmul.mubr.f32.gmra.mrb[34].mxu1 %v1251_v2  ;;  %v1253_v1 = vmul.f32 %v1125_v30, %v842_v29  ;;  %3849 = vmatpush3.bf16.msra.mxu0 %v3846_v25  ;;  %v1144_v30 = vld [vmem:[%s4350_s29 + $0x228] sm:$0xff] }
 0x14a   : > { %v1254_v31 = vmul.f32 %v1126_v28, %v844_v13 }
 0x14c   : > { %v848_v33 = vpop.f32.mrb[52].mxu0  ;;  %1559 = vmatprep.mubr.f32.mxu1 %v1254_v31  ;;  %v1143_v31 = vld [vmem:[%s4350_s29 + $0x220] sm:$0xff] }
 0x14d   : > { %v850_v35 = vpop.f32.mrb[53].mxu0  ;;  %1560 = vmatmul.mubr.f32.gmra.mrb[36].mxu1 %v1253_v1  ;;  %v1255_v36 = vmul.f32 %v1127_v34, %v848_v33  ;;  %v1146_v34 = vld [vmem:[%s4350_s29 + $0x238] sm:$0xff] }
 0x14e   : > { %v1256_v5 = vmul.f32 %v1128_v32, %v850_v35 }
 0x150   : > { %v854_v38 = vpop.f32.mrb[54].mxu0  ;;  %1564 = vmatprep.mubr.f32.mxu1 %v1256_v5  ;;  %v1145_v5 = vld [vmem:[%s4350_s29 + $0x230] sm:$0xff] }
 0x151   : > { %v856_v40 = vpop.f32.mrb[55].mxu0  ;;  %1565 = vmatmul.mubr.f32.gmra.mrb[38].mxu1 %v1255_v36  ;;  %v1257_v7 = vmul.f32 %v1129_v39, %v854_v38  ;;  %v1148_v39 = vld [vmem:[%s4350_s29 + $0x248] sm:$0xff] }
 0x152   : > { %v1258_v4 = vmul.f32 %v1130_v37, %v856_v40 }
 0x154   : > { %v860_v9 = vpop.f32.mrb[56].mxu0  ;;  %1569 = vmatprep.mubr.f32.mxu1 %v1258_v4  ;;  %v1147_v4 = vld [vmem:[%s4350_s29 + $0x240] sm:$0xff] }
 0x155   : > { %v862_v43 = vpop.f32.mrb[57].mxu0  ;;  %1570 = vmatmul.mubr.f32.gmra.mrb[40].mxu1 %v1257_v7  ;;  %v1259_v45 = vmul.f32 %v1131_v42, %v860_v9  ;;  %v1150_v42 = vld [vmem:[%s4350_s29 + $0x258] sm:$0xff] }
 0x156   : > { %v1260_v44 = vmul.f32 %v1132_v41, %v862_v43 }
 0x158   : > { %v866_v47 = vpop.f32.mrb[58].mxu0  ;;  %1574 = vmatprep.mubr.f32.mxu1 %v1260_v44  ;;  %v1149_v44 = vld [vmem:[%s4350_s29 + $0x250] sm:$0xff] }
 0x159   : > { %v868_v48 = vpop.f32.mrb[59].mxu0  ;;  %1575 = vmatmul.mubr.f32.gmra.mrb[42].mxu1 %v1259_v45  ;;  %v1261_v52 = vmul.f32 %v1133_v8, %v866_v47  ;;  %v1152_v8 = vld [vmem:[%s4350_s29 + $0x268] sm:$0xff] }
 0x15a   : > { %v1262_v49 = vmul.f32 %v1134_v46, %v868_v48 }
 0x15c   : > { %v872_v55 = vpop.f32.mrb[60].mxu0  ;;  %1579 = vmatprep.mubr.f32.mxu1 %v1262_v49  ;;  %v1151_v49 = vld [vmem:[%s4350_s29 + $0x260] sm:$0xff] }
 0x15d   : > { %v874_v58 = vpop.f32.mrb[61].mxu0  ;;  %1580 = vmatmul.mubr.f32.gmra.mrb[44].mxu1 %v1261_v52  ;;  %v1263_v3 = vmul.f32 %v1135_v57, %v872_v55  ;;  %v1153_v55 = vld [vmem:[%s4350_s29 + $0x270] sm:$0xff] }
 0x15e   : > { %v1264_v61 = vmul.f32 %v1136_v53, %v874_v58  ;;  %v1154_v53 = vld [vmem:[%s4350_s29 + $0x278] sm:$0xff] }
 0x160   : > { %v878_v60 = vpop.f32.mrb[62].mxu0  ;;  %1584 = vmatprep.mubr.f32.mxu1 %v1264_v61 }
 0x161   : > { %v880_v12 = vpop.f32.mrb[63].mxu0  ;;  %1585 = vmatmul.mubr.f32.gmra.mrb[46].mxu1 %v1263_v3  ;;  %v1265_v59 = vmul.f32 %v1137_v11, %v878_v60  ;;  %v1155_v3 = vld [vmem:[%s4350_s29 + $0x280] sm:$0xff]  ;;  %v1158_v11 = vld [vmem:[%s4350_s29 + $0x298] sm:$0xff] }
 0x162   : > { %v1266_v14 = vmul.f32 %v1138_v6, %v880_v12 }
 0x164   : > { %v884_v19 = vpop.f32.mrb[64].mxu0  ;;  %1589 = vmatprep.mubr.f32.mxu1 %v1266_v14  ;;  %v1157_v14 = vld [vmem:[%s4350_s29 + $0x290] sm:$0xff] }
 0x165   : > { %v886_v20 = vpop.f32.mrb[65].mxu0  ;;  %1590 = vmatmul.mubr.f32.gmra.mrb[48].mxu1 %v1265_v59  ;;  %v1267_v24 = vmul.f32 %v1139_v63, %v884_v19  ;;  %v1159_v19 = vld [vmem:[%s4350_s29 + $0x2a0] sm:$0xff] }
 0x166   : > { %v1268_v21 = vmul.f32 %v1140_v17, %v886_v20  ;;  %v1160_v17 = vld [vmem:[%s4350_s29 + $0x2a8] sm:$0xff] }
 0x168   : > { %v890_v26 = vpop.f32.mrb[66].mxu0  ;;  %1594 = vmatprep.mubr.f32.mxu1 %v1268_v21 }
 0x169   : > { %v892_v2 = vpop.f32.mrb[67].mxu0  ;;  %1595 = vmatmul.mubr.f32.gmra.mrb[50].mxu1 %v1267_v24  ;;  %v1269_v29 = vmul.f32 %v1141_v27, %v890_v26  ;;  %v1161_v24 = vld [vmem:[%s4350_s29 + $0x2b0] sm:$0xff]  ;;  %v1164_v27 = vld [vmem:[%s4350_s29 + $0x2c8] sm:$0xff] }
 0x16a   : > { %v1270_v28 = vmul.f32 %v1142_v62, %v892_v2 }
 0x16c   : > { %v896_v13 = vpop.f32.mrb[68].mxu0  ;;  %1599 = vmatprep.mubr.f32.mxu1 %v1270_v28  ;;  %v1163_v28 = vld [vmem:[%s4350_s29 + $0x2c0] sm:$0xff] }
 0x16d   : > { %v898_v1 = vpop.f32.mrb[69].mxu0  ;;  %1600 = vmatmul.mubr.f32.gmra.mrb[52].mxu1 %v1269_v29  ;;  %v1271_v33 = vmul.f32 %v1143_v31, %v896_v13  ;;  %v1166_v31 = vld [vmem:[%s4350_s29 + $0x2d8] sm:$0xff] }
 0x16e   : > { %v1272_v32 = vmul.f32 %v1144_v30, %v898_v1 }
 0x170   : > { %v902_v35 = vpop.f32.mrb[70].mxu0  ;;  %1604 = vmatprep.mubr.f32.mxu1 %v1272_v32  ;;  %v1165_v32 = vld [vmem:[%s4350_s29 + $0x2d0] sm:$0xff] }
 0x171   : > { %v904_v36 = vpop.f32.mrb[71].mxu0  ;;  %1605 = vmatmul.mubr.f32.gmra.mrb[54].mxu1 %v1271_v33  ;;  %v1273_v38 = vmul.f32 %v1145_v5, %v902_v35  ;;  %v1168_v5 = vld [vmem:[%s4350_s29 + $0x2e8] sm:$0xff] }
 0x172   : > { %v1274_v37 = vmul.f32 %v1146_v34, %v904_v36 }
 0x174   : > { %v908_v40 = vpop.f32.mrb[72].mxu0  ;;  %1609 = vmatprep.mubr.f32.mxu1 %v1274_v37  ;;  %v1167_v37 = vld [vmem:[%s4350_s29 + $0x2e0] sm:$0xff] }
 0x175   : > { %v910_v7 = vpop.f32.mrb[73].mxu0  ;;  %1610 = vmatmul.mubr.f32.gmra.mrb[56].mxu1 %v1273_v38  ;;  %v1275_v9 = vmul.f32 %v1147_v4, %v908_v40  ;;  %v1170_v4 = vld [vmem:[%s4350_s29 + $0x2f8] sm:$0xff] }
 0x176   : > { %v1276_v41 = vmul.f32 %v1148_v39, %v910_v7 }
 0x178   : > { %v914_v43 = vpop.f32.mrb[74].mxu0  ;;  %1614 = vmatprep.mubr.f32.mxu1 %v1276_v41  ;;  %v1169_v41 = vld [vmem:[%s4350_s29 + $0x2f0] sm:$0xff] }
 0x179   : > { %v916_v45 = vpop.f32.mrb[75].mxu0  ;;  %1615 = vmatmul.mubr.f32.gmra.mrb[58].mxu1 %v1275_v9  ;;  %v1277_v47 = vmul.f32 %v1149_v44, %v914_v43  ;;  %v1172_v44 = vld [vmem:[%s4350_s29 + $0x308] sm:$0xff] }
 0x17a   : > { %v1278_v46 = vmul.f32 %v1150_v42, %v916_v45 }
 0x17c   : > { %v920_v48 = vpop.f32.mrb[76].mxu0  ;;  %1619 = vmatprep.mubr.f32.mxu1 %v1278_v46  ;;  %v1171_v46 = vld [vmem:[%s4350_s29 + $0x300] sm:$0xff] }
 0x17d   : > { %v922_v50 = vpop.f32.mrb[77].mxu0  ;;  %1620 = vmatmul.mubr.f32.gmra.mrb[60].mxu1 %v1277_v47  ;;  %v1279_v52 = vmul.f32 %v1151_v49, %v920_v48  ;;  %v1174_v49 = vld [vmem:[%s4350_s29 + $0x318] sm:$0xff] }
 0x17e   : > { %v1280_v51 = vmul.f32 %v1152_v8, %v922_v50 }
 0x180   : > { %v926_v54 = vpop.f32.mrb[78].mxu0  ;;  %1624 = vmatprep.mubr.f32.mxu1 %v1280_v51  ;;  %v1173_v51 = vld [vmem:[%s4350_s29 + $0x310] sm:$0xff] }
 0x181   : > { %v928_v57 = vpop.f32.mrb[79].mxu0  ;;  %1625 = vmatmul.mubr.f32.gmra.mrb[62].mxu1 %v1279_v52  ;;  %v1281_v61 = vmul.f32 %v1153_v55, %v926_v54  ;;  %v1176_v55 = vld [vmem:[%s4350_s29 + $0x328] sm:$0xff] }
 0x182   : > { %v1282_v58 = vmul.f32 %v1154_v53, %v928_v57 }
 0x184   : > { %v932_v56 = vpop.f32.mrb[80].mxu0  ;;  %1629 = vmatprep.mubr.f32.mxu1 %v1282_v58  ;;  %v1175_v58 = vld [vmem:[%s4350_s29 + $0x320] sm:$0xff] }
 0x185   : > { %v934_v6 = vpop.f32.mrb[81].mxu0  ;;  %1630 = vmatmul.mubr.f32.gmra.mrb[64].mxu1 %v1281_v61  ;;  %v1283_v60 = vmul.f32 %v1155_v3, %v932_v56  ;;  %v1178_v3 = vld [vmem:[%s4350_s29 + $0x338] sm:$0xff] }
 0x186   : > { %v1284_v10 = vmul.f32 %v1156_v0, %v934_v6 }
 0x188   : > { %v938_v12 = vpop.f32.mrb[82].mxu0  ;;  %1634 = vmatprep.mubr.f32.mxu1 %v1284_v10  ;;  %v1177_v10 = vld [vmem:[%s4350_s29 + $0x330] sm:$0xff] }
 0x189   : > { %v940_v15 = vpop.f32.mrb[83].mxu0  ;;  %1635 = vmatmul.mubr.f32.gmra.mrb[66].mxu1 %v1283_v60  ;;  %v1285_v59 = vmul.f32 %v1157_v14, %v938_v12  ;;  %v1180_v14 = vld [vmem:[%s4350_s29 + $0x348] sm:$0xff] }
 0x18a   : > { %v1286_v16 = vmul.f32 %v1158_v11, %v940_v15 }
 0x18c   : > { %v944_v18 = vpop.f32.mrb[84].mxu0  ;;  %1639 = vmatprep.mubr.f32.mxu1 %v1286_v16  ;;  %v1179_v16 = vld [vmem:[%s4350_s29 + $0x340] sm:$0xff] }
 0x18d   : > { %v946_v63 = vpop.f32.mrb[85].mxu0  ;;  %1640 = vmatmul.mubr.f32.gmra.mrb[68].mxu1 %v1285_v59  ;;  %v1287_v21 = vmul.f32 %v1159_v19, %v944_v18  ;;  %v1182_v19 = vld [vmem:[%s4350_s29 + $0x358] sm:$0xff] }
 0x18e   : > { %v1288_v20 = vmul.f32 %v1160_v17, %v946_v63  ;;  %v2476_v63 = vld [vmem:[%s4979_s7] sm:$0xff] }
 0x190   : > { %v950_v23 = vpop.f32.mrb[86].mxu0  ;;  %1644 = vmatprep.mubr.f32.mxu1 %v1288_v20  ;;  %v2477_v20 = vld [vmem:[%s4979_s7 + $0x8] sm:$0xff] }
 0x191   : > { %v952_v62 = vpop.f32.mrb[87].mxu0  ;;  %1645 = vmatmul.mubr.f32.gmra.mrb[70].mxu1 %v1287_v21  ;;  %v1289_v26 = vmul.f32 %v1161_v24, %v950_v23  ;;  %v3850_v23 = vpack.c.bf16 %v2477_v20, %v2476_v63 }
 0x192   : > { %v1290_v25 = vmul.f32 %v1162_v22, %v952_v62  ;;  %v1181_v22 = vld [vmem:[%s4350_s29 + $0x350] sm:$0xff] }
 0x193   : > { %3851 = vmatprep.subr.bf16.mxu1 %v3850_v23 }
 0x194   : > { %v956_v2 = vpop.f32.mrb[88].mxu0  ;;  %1649 = vmatprep.mubr.f32.mxu1 %v1290_v25  ;;  %3853 = vmatpush3.bf16.msra.mxu1 %v3850_v23  ;;  %v1201_v23 = vld [vmem:[%s4350_s29 + $0x3f0] sm:$0xff] }
 0x195   : > { %v958_v29 = vpop.f32.mrb[89].mxu0  ;;  %1650 = vmatmul.mubr.f32.gmra.mrb[72].mxu1 %v1289_v26  ;;  %v1291_v13 = vmul.f32 %v1163_v28, %v956_v2  ;;  %v1184_v26 = vld [vmem:[%s4350_s29 + $0x368] sm:$0xff]  ;;  %v1183_v2 = vld [vmem:[%s4350_s29 + $0x360] sm:$0xff] }
 0x196   : > { %v1292_v30 = vmul.f32 %v1164_v27, %v958_v29 }
 0x198   : > { %v962_v1 = vpop.f32.mrb[90].mxu0  ;;  %1654 = vmatprep.mubr.f32.mxu1 %v1292_v30 }
 0x199   : > { %v964_v33 = vpop.f32.mrb[91].mxu0  ;;  %1655 = vmatmul.mubr.f32.gmra.mrb[74].mxu1 %v1291_v13  ;;  %v1293_v35 = vmul.f32 %v1165_v32, %v962_v1  ;;  %v1186_v13 = vld [vmem:[%s4350_s29 + $0x378] sm:$0xff]  ;;  %v1185_v1 = vld [vmem:[%s4350_s29 + $0x370] sm:$0xff] }
 0x19a   : > { %v1294_v34 = vmul.f32 %v1166_v31, %v964_v33 }
 0x19c   : > { %v968_v36 = vpop.f32.mrb[92].mxu0  ;;  %1659 = vmatprep.mubr.f32.mxu1 %v1294_v34 }
 0x19d   : > { %v970_v38 = vpop.f32.mrb[93].mxu0  ;;  %1660 = vmatmul.mubr.f32.gmra.mrb[76].mxu1 %v1293_v35  ;;  %v1295_v40 = vmul.f32 %v1167_v37, %v968_v36  ;;  %v1188_v35 = vld [vmem:[%s4350_s29 + $0x388] sm:$0xff]  ;;  %v1187_v36 = vld [vmem:[%s4350_s29 + $0x380] sm:$0xff] }
 0x19e   : > { %v1296_v39 = vmul.f32 %v1168_v5, %v970_v38 }
 0x1a0   : > { %v974_v7 = vpop.f32.mrb[94].mxu0  ;;  %1664 = vmatprep.mubr.f32.mxu1 %v1296_v39 }
 0x1a1   : > { %v976_v9 = vpop.f32.mrb[95].mxu0  ;;  %1665 = vmatmul.mubr.f32.gmra.mrb[78].mxu1 %v1295_v40  ;;  %v1297_v43 = vmul.f32 %v1169_v41, %v974_v7  ;;  %v1190_v40 = vld [vmem:[%s4350_s29 + $0x398] sm:$0xff]  ;;  %v1189_v7 = vld [vmem:[%s4350_s29 + $0x390] sm:$0xff] }
 0x1a2   : > { %v1298_v42 = vmul.f32 %v1170_v4, %v976_v9 }
 0x1a4   : > { %v980_v45 = vpop.f32.mrb[96].mxu0  ;;  %1669 = vmatprep.mubr.f32.mxu1 %v1298_v42 }
 0x1a5   : > { %v982_v47 = vpop.f32.mrb[97].mxu0  ;;  %1670 = vmatmul.mubr.f32.gmra.mrb[80].mxu1 %v1297_v43  ;;  %v1299_v48 = vmul.f32 %v1171_v46, %v980_v45  ;;  %v1192_v43 = vld [vmem:[%s4350_s29 + $0x3a8] sm:$0xff]  ;;  %v1191_v45 = vld [vmem:[%s4350_s29 + $0x3a0] sm:$0xff] }
 0x1a6   : > { %v1300_v8 = vmul.f32 %v1172_v44, %v982_v47 }
 0x1a8   : > { %v986_v50 = vpop.f32.mrb[98].mxu0  ;;  %1674 = vmatprep.mubr.f32.mxu1 %v1300_v8 }
 0x1a9   : > { %v988_v52 = vpop.f32.mrb[99].mxu0  ;;  %1675 = vmatmul.mubr.f32.gmra.mrb[82].mxu1 %v1299_v48  ;;  %v1301_v54 = vmul.f32 %v1173_v51, %v986_v50  ;;  %v1194_v48 = vld [vmem:[%s4350_s29 + $0x3b8] sm:$0xff]  ;;  %v1193_v50 = vld [vmem:[%s4350_s29 + $0x3b0] sm:$0xff] }
 0x1aa   : > { %v1302_v53 = vmul.f32 %v1174_v49, %v988_v52 }
 0x1ac   : > { %v992_v57 = vpop.f32.mrb[100].mxu0  ;;  %1679 = vmatprep.mubr.f32.mxu1 %v1302_v53 }
 0x1ad   : > { %v994_v61 = vpop.f32.mrb[101].mxu0  ;;  %1680 = vmatmul.mubr.f32.gmra.mrb[84].mxu1 %v1301_v54  ;;  %v1303_v56 = vmul.f32 %v1175_v58, %v992_v57  ;;  %v1196_v54 = vld [vmem:[%s4350_s29 + $0x3c8] sm:$0xff]  ;;  %v1195_v57 = vld [vmem:[%s4350_s29 + $0x3c0] sm:$0xff] }
 0x1ae   : > { %v1304_v0 = vmul.f32 %v1176_v55, %v994_v61 }
 0x1b0   : > { %v998_v6 = vpop.f32.mrb[102].mxu0  ;;  %1684 = vmatprep.mubr.f32.mxu1 %v1304_v0 }
 0x1b1   : > { %v1000_v60 = vpop.f32.mrb[103].mxu0  ;;  %1685 = vmatmul.mubr.f32.gmra.mrb[86].mxu1 %v1303_v56  ;;  %v1305_v12 = vmul.f32 %v1177_v10, %v998_v6  ;;  %v1198_v56 = vld [vmem:[%s4350_s29 + $0x3d8] sm:$0xff]  ;;  %v1197_v6 = vld [vmem:[%s4350_s29 + $0x3d0] sm:$0xff] }
 0x1b2   : > { %v1306_v11 = vmul.f32 %v1178_v3, %v1000_v60 }
 0x1b4   : > { %v1004_v15 = vpop.f32.mrb[104].mxu0  ;;  %1689 = vmatprep.mubr.f32.mxu1 %v1306_v11 }
 0x1b5   : > { %v1006_v59 = vpop.f32.mrb[105].mxu0  ;;  %1690 = vmatmul.mubr.f32.gmra.mrb[88].mxu1 %v1305_v12  ;;  %v1307_v18 = vmul.f32 %v1179_v16, %v1004_v15  ;;  %v1200_v15 = vld [vmem:[%s4350_s29 + $0x3e8] sm:$0xff] }
 0x1b6   : > { %v1308_v17 = vmul.f32 %v1180_v14, %v1006_v59  ;;  %v1199_v59 = vld [vmem:[%s4350_s29 + $0x3e0] sm:$0xff] }
 0x1b8   : > { %v1010_v21 = vpop.f32.mrb[106].mxu0  ;;  %1694 = vmatprep.mubr.f32.mxu1 %v1308_v17 }
 0x1b9   : > { %v1012_v24 = vpop.f32.mrb[107].mxu0  ;;  %1695 = vmatmul.mubr.f32.gmra.mrb[90].mxu1 %v1307_v18  ;;  %v1309_v25 = vmul.f32 %v1181_v22, %v1010_v21  ;;  %v1202_v21 = vld [vmem:[%s4350_s29 + $0x3f8] sm:$0xff]  ;;  %s4839_s29 = scalar_lea.vmem %s4981_s9, %s3209_s16 }
 0x1ba   : > { %v1310_v62 = vmul.f32 %v1182_v19, %v1012_v24 }
 0x1bc   : > { %v1016_v27 = vpop.f32.mrb[108].mxu0  ;;  %1699 = vmatprep.mubr.f32.mxu1 %v1310_v62 }
 0x1bd   : > { %v1018_v28 = vpop.f32.mrb[109].mxu0  ;;  %1700 = vmatmul.mubr.f32.gmra.mrb[92].mxu1 %v1309_v25  ;;  %v1311_v30 = vmul.f32 %v1183_v2, %v1016_v27  ;;  %v4545_v2 = vld [vmem:[%s4976_s4] ss:$0 sm:$0xff] }
 0x1be   : > { %v1312_v29 = vmul.f32 %v1184_v26, %v1018_v28 }
 0x1c0   : > { %v1022_v31 = vpop.f32.mrb[110].mxu0  ;;  %1704 = vmatprep.mubr.f32.mxu1 %v1312_v29 }
 0x1c1   : > { %v1024_v32 = vpop.f32.mrb[111].mxu0  ;;  %1705 = vmatmul.mubr.f32.gmra.mrb[94].mxu1 %v1311_v30  ;;  %v1313_v34 = vmul.f32 %v1185_v1, %v1022_v31 }
 0x1c2   : > { %v1314_v33 = vmul.f32 %v1186_v13, %v1024_v32 }
 0x1c4   : > { %v1028_v5 = vpop.f32.mrb[112].mxu0  ;;  %1709 = vmatprep.mubr.f32.mxu1 %v1314_v33 }
 0x1c5   : > { %v1030_v37 = vpop.f32.mrb[113].mxu0  ;;  %1710 = vmatmul.mubr.f32.gmra.mrb[96].mxu1 %v1313_v34  ;;  %v1315_v39 = vmul.f32 %v1187_v36, %v1028_v5 }
 0x1c6   : > { %v1316_v38 = vmul.f32 %v1188_v35, %v1030_v37 }
 0x1c8   : > { %v1034_v4 = vpop.f32.mrb[114].mxu0  ;;  %1714 = vmatprep.mubr.f32.mxu1 %v1316_v38 }
 0x1c9   : > { %v1036_v41 = vpop.f32.mrb[115].mxu0  ;;  %1715 = vmatmul.mubr.f32.gmra.mrb[98].mxu1 %v1315_v39  ;;  %v1317_v42 = vmul.f32 %v1189_v7, %v1034_v4 }
 0x1ca   : > { %v1318_v9 = vmul.f32 %v1190_v40, %v1036_v41  ;;  %v2478_v41 = vld [vmem:[%s4979_s7 + $0x10] sm:$0xff] }
 0x1cc   : > { %v1040_v44 = vpop.f32.mrb[116].mxu0  ;;  %1719 = vmatprep.mubr.f32.mxu1 %v1318_v9  ;;  %v2479_v9 = vld [vmem:[%s4979_s7 + $0x18] sm:$0xff] }
 0x1cd   : > { %v1042_v46 = vpop.f32.mrb[117].mxu0  ;;  %1720 = vmatmul.mubr.f32.gmra.mrb[100].mxu1 %v1317_v42  ;;  %v1319_v8 = vmul.f32 %v1191_v45, %v1040_v44  ;;  %v3854_v44 = vpack.c.bf16 %v2479_v9, %v2478_v41 }
 0x1ce   : > { %v1320_v47 = vmul.f32 %v1192_v43, %v1042_v46 }
 0x1cf   : > { %3855 = vmatprep.subr.bf16.mxu1 %v3854_v44 }
 0x1d0   : > { %v1046_v49 = vpop.f32.mrb[118].mxu0  ;;  %1724 = vmatprep.mubr.f32.mxu1 %v1320_v47  ;;  %3857 = vmatpush3.bf16.msra.mxu1 %v3854_v44 }
 0x1d1   : > { %v1048_v51 = vpop.f32.mrb[119].mxu0  ;;  %1725 = vmatmul.mubr.f32.gmra.mrb[102].mxu1 %v1319_v8  ;;  %v1321_v53 = vmul.f32 %v1193_v50, %v1046_v49 }
 0x1d2   : > { %v1322_v52 = vmul.f32 %v1194_v48, %v1048_v51 }
 0x1d4   : > { %v1052_v55 = vpop.f32.mrb[120].mxu0  ;;  %1729 = vmatprep.mubr.f32.mxu1 %v1322_v52 }
 0x1d5   : > { %v1054_v58 = vpop.f32.mrb[121].mxu0  ;;  %1730 = vmatmul.mubr.f32.gmra.mrb[104].mxu1 %v1321_v53  ;;  %v1323_v0 = vmul.f32 %v1195_v57, %v1052_v55 }
 0x1d6   : > { %v1324_v61 = vmul.f32 %v1196_v54, %v1054_v58 }
 0x1d8   : > { %v1058_v3 = vpop.f32.mrb[122].mxu0  ;;  %v4532_v10 = vpop.f32.mrb[0].mxu1  ;;  %1734 = vmatprep.mubr.f32.mxu1 %v1324_v61 }
 0x1d9   : > { %v1060_v60 = vpop.f32.mrb[123].mxu0  ;;  %v1473_v11 = vpop.f32.mrb[1].mxu1  ;;  %1735 = vmatmul.mubr.f32.gmra.mrb[106].mxu1 %v1323_v0  ;;  %v1325_v14 = vmul.f32 %v1197_v6, %v1058_v3 }
 0x1da   : > { %v1326_v12 = vmul.f32 %v1198_v56, %v1060_v60  ;;  %v1472_v56 = vadd.f32 %v4545_v2, %v4532_v10 }
 0x1dc   : > { %v1064_v16 = vpop.f32.mrb[124].mxu0  ;;  %v4536_v17 = vpop.f32.mrb[2].mxu1  ;;  %1739 = vmatprep.mubr.f32.mxu1 %v1326_v12 }
 0x1dd   : > { %v1066_v18 = vpop.f32.mrb[125].mxu0  ;;  %v1478_v19 = vpop.f32.mrb[3].mxu1  ;;  %1740 = vmatmul.mubr.f32.gmra.mrb[108].mxu1 %v1325_v14  ;;  %v1327_v20 = vmul.f32 %v1199_v59, %v1064_v16  ;;  %v1477_v60 = vadd.f32 %v4545_v2, %v4536_v17  ;;  %v1762_v16 = vmax.f32 %v1472_v56, 0.0 }
 0x1de   : > { %v1328_v63 = vmul.f32 %v1200_v15, %v1066_v18 }
 0x1df   : > { %v1763_v19 = vmax.f32 %v1477_v60, 0.0 }
 0x1e0   : > { %v1070_v22 = vpop.f32.mrb[126].mxu0  ;;  %v4540_v24 = vpop.f32.mrb[4].mxu1  ;;  %1744 = vmatprep.mubr.f32.mxu1 %v1328_v63 }
 0x1e1   : > { %v1072_v62 = vpop.f32.mrb[127].mxu0  ;;  %v1483_v25 = vpop.f32.mrb[5].mxu1  ;;  %1745 = vmatmul.mubr.f32.gmra.mrb[110].mxu1 %v1327_v20  ;;  %v1329_v27 = vmul.f32 %v1201_v23, %v1070_v22  ;;  %v1482_v59 = vadd.f32 %v4545_v2, %v4540_v24 }
 0x1e2   : > { %v1330_v26 = vmul.f32 %v1202_v21, %v1072_v62 }
 0x1e3   : > { %v1764_v17 = vmax.f32 %v1482_v59, 0.0 }
 0x1e4   : > { %v1436_v28 = vpop.f32.mrb[128].mxu0  ;;  %v1486_v29 = vpop.f32.mrb[6].mxu1  ;;  %1749 = vmatprep.mubr.f32.mxu1 %v1330_v26 }
 0x1e5   : > { %v1437_v30 = vadd.f32 %v4545_v2, %v1436_v28  ;;  %v1438_v13 = vpop.f32.mrb[129].mxu0  ;;  %v1488_v31 = vpop.f32.mrb[7].mxu1  ;;  %1750 = vmatmul.mubr.f32.gmra.mrb[112].mxu1 %v1329_v27  ;;  %v1487_v10 = vadd.f32 %v4545_v2, %v1486_v29 }
 0x1e7   : > { %v1755_v1 = vmax.f32 %v1437_v30, 0.0  ;;  %v1765_v22 = vmax.f32 %v1487_v10, 0.0 }
 0x1e8   : > { %v1441_v32 = vpop.f32.mrb[130].mxu0  ;;  %v1491_v33 = vpop.f32.mrb[8].mxu1 }
 0x1e9   : > { %v1442_v34 = vadd.f32 %v4545_v2, %v1441_v32  ;;  %v1443_v35 = vpop.f32.mrb[131].mxu0  ;;  %v1493_v5 = vpop.f32.mrb[9].mxu1  ;;  %3570 = vmatprep.mubr.msk.f32.mxu0 %vm1834_vm1, %v1755_v1  ;;  %v1492_v20 = vadd.f32 %v4545_v2, %v1491_v33 }
 0x1eb   : > { %v1756_v36 = vmax.f32 %v1442_v34, 0.0  ;;  %v1766_v24 = vmax.f32 %v1492_v20, 0.0 }
 0x1ec   : > { %v1446_v37 = vpop.f32.mrb[132].mxu0  ;;  %v1496_v38 = vpop.f32.mrb[10].mxu1 }
 0x1ed   : > { %v1447_v39 = vadd.f32 %v4545_v2, %v1446_v37  ;;  %v1448_v40 = vpop.f32.mrb[133].mxu0  ;;  %v1498_v4 = vpop.f32.mrb[11].mxu1  ;;  %3571 = vmatmul.mubr.msk.f32.vlgmr.msra.gmra.mrb[142].mxu0 %vm1834_vm1, %v1756_v36  ;;  %v1497_v23 = vadd.f32 %v4545_v2, %v1496_v38 }
 0x1ef   : > { %v1757_v7 = vmax.f32 %v1447_v39, 0.0  ;;  %v1767_v27 = vmax.f32 %v1497_v23, 0.0 }
 0x1f0   : > { %v1451_v42 = vpop.f32.mrb[134].mxu0  ;;  %v1501_v43 = vpop.f32.mrb[12].mxu1 }
 0x1f1   : > { %v1452_v45 = vadd.f32 %v4545_v2, %v1451_v42  ;;  %v1453_v46 = vpop.f32.mrb[135].mxu0  ;;  %v1503_v47 = vpop.f32.mrb[13].mxu1  ;;  %3573 = vmatprep.mubr.msk.f32.mxu0 %vm1834_vm1, %v1757_v7  ;;  %v1502_v25 = vadd.f32 %v4545_v2, %v1501_v43 }
 0x1f3   : > { %v1758_v8 = vmax.f32 %v1452_v45, 0.0  ;;  %v1768_v30 = vmax.f32 %v1502_v25, 0.0 }
 0x1f4   : > { %v1456_v48 = vpop.f32.mrb[136].mxu0  ;;  %v1506_v49 = vpop.f32.mrb[14].mxu1 }
 0x1f5   : > { %v1457_v50 = vadd.f32 %v4545_v2, %v1456_v48  ;;  %v1458_v51 = vpop.f32.mrb[137].mxu0  ;;  %v1508_v52 = vpop.f32.mrb[15].mxu1  ;;  %3574 = vmatmul.mubr.msk.f32.gmra.mrb[144].mxu0 %vm1834_vm1, %v1758_v8  ;;  %v1507_v28 = vadd.f32 %v4545_v2, %v1506_v49 }
 0x1f7   : > { %v1759_v53 = vmax.f32 %v1457_v50, 0.0  ;;  %v1769_v1 = vmax.f32 %v1507_v28, 0.0 }
 0x1f8   : > { %v1461_v54 = vpop.f32.mrb[138].mxu0  ;;  %v1511_v55 = vpop.f32.mrb[16].mxu1 }
 0x1f9   : > { %v1462_v57 = vadd.f32 %v4545_v2, %v1461_v54  ;;  %v1463_v58 = vpop.f32.mrb[139].mxu0  ;;  %v1513_v61 = vpop.f32.mrb[17].mxu1  ;;  %3576 = vmatprep.mubr.msk.f32.mxu0 %vm1834_vm1, %v1759_v53  ;;  %v1512_v13 = vadd.f32 %v4545_v2, %v1511_v55 }
 0x1fb   : > { %v1760_v0 = vmax.f32 %v1462_v57, 0.0  ;;  %v1770_v34 = vmax.f32 %v1512_v13, 0.0 }
 0x1fc   : > { %v1466_v3 = vpop.f32.mrb[140].mxu0  ;;  %v1516_v6 = vpop.f32.mrb[18].mxu1 }
 0x1fd   : > { %v1467_v11 = vadd.f32 %v4545_v2, %v1466_v3  ;;  %v1468_v12 = vpop.f32.mrb[141].mxu0  ;;  %v1518_v14 = vpop.f32.mrb[19].mxu1  ;;  %3577 = vmatmul.mubr.msk.f32.gmra.mrb[146].mxu0 %vm1834_vm1, %v1760_v0  ;;  %v1517_v32 = vadd.f32 %v4545_v2, %v1516_v6 }
 0x1ff   : > { %v1761_v15 = vmax.f32 %v1467_v11, 0.0  ;;  %v1771_v36 = vmax.f32 %v1517_v32, 0.0 }
 0x200   : > { %v1521_v18 = vpop.f32.mrb[20].mxu1 }
 0x201   : > { %v1523_v63 = vpop.f32.mrb[21].mxu1  ;;  %3579 = vmatprep.mubr.msk.f32.mxu0 %vm1834_vm1, %v1761_v15  ;;  %v1522_v35 = vadd.f32 %v4545_v2, %v1521_v18  ;;  %v2480_v15 = vld [vmem:[%s4979_s7 + $0x20] sm:$0xff] }
 0x202   : > { %3580 = vmatmul.mubr.msk.f32.gmra.mrb[148].mxu0 %vm1834_vm1, %v1762_v16  ;;  %v2481_v16 = vld [vmem:[%s4979_s7 + $0x28] sm:$0xff] }
 0x203   : > { %3582 = vmatprep.mubr.msk.f32.mxu0 %vm1834_vm1, %v1763_v19  ;;  %v1772_v39 = vmax.f32 %v1522_v35, 0.0  ;;  %v3858_v18 = vpack.c.bf16 %v2481_v16, %v2480_v15 }
 0x204   : > { %v1526_v21 = vpop.f32.mrb[22].mxu1 }
 0x205   : > { %v1528_v62 = vpop.f32.mrb[23].mxu1  ;;  %v1527_v37 = vadd.f32 %v4545_v2, %v1526_v21  ;;  %3859 = vmatprep.subr.bf16.mxu1 %v3858_v18 }
 0x206   : > { %3583 = vmatmul.mubr.msk.f32.gmra.mrb[150].mxu0 %vm1834_vm1, %v1764_v17  ;;  %3861 = vmatpush3.bf16.msra.mxu1 %v3858_v18 }
 0x207   : > { %3585 = vmatprep.mubr.msk.f32.mxu0 %vm1834_vm1, %v1765_v22  ;;  %v1773_v7 = vmax.f32 %v1527_v37, 0.0 }
 0x208   : > { %v1531_v26 = vpop.f32.mrb[24].mxu1 }
 0x209   : > { %v1533_v29 = vpop.f32.mrb[25].mxu1  ;;  %v1532_v40 = vadd.f32 %v4545_v2, %v1531_v26 }
 0x20a   : > { %3586 = vmatmul.mubr.msk.f32.gmra.mrb[152].mxu0 %vm1834_vm1, %v1766_v24 }
 0x20b   : > { %3588 = vmatprep.mubr.msk.f32.mxu0 %vm1834_vm1, %v1767_v27  ;;  %v1774_v42 = vmax.f32 %v1532_v40, 0.0 }
 0x20c   : > { %v1536_v31 = vpop.f32.mrb[26].mxu1 }
 0x20d   : > { %v1538_v33 = vpop.f32.mrb[27].mxu1  ;;  %v1537_v41 = vadd.f32 %v4545_v2, %v1536_v31 }
 0x20e   : > { %3589 = vmatmul.mubr.msk.f32.gmra.mrb[154].mxu0 %vm1834_vm1, %v1768_v30  ;;  %v2482_v33 = vld [vmem:[%s4979_s7 + $0x30] sm:$0xff] }
 0x20f   : > { %3591 = vmatprep.mubr.msk.f32.mxu0 %vm1834_vm1, %v1769_v1  ;;  %v1775_v45 = vmax.f32 %v1537_v41, 0.0 }
 0x210   : > { %v1541_v5 = vpop.f32.mrb[28].mxu1 }
 0x211   : > { %v1543_v38 = vpop.f32.mrb[29].mxu1  ;;  %v1542_v43 = vadd.f32 %v4545_v2, %v1541_v5 }
 0x212   : > { %3592 = vmatmul.mubr.msk.f32.gmra.mrb[156].mxu0 %vm1834_vm1, %v1770_v34  ;;  %v2483_v34 = vld [vmem:[%s4979_s7 + $0x38] sm:$0xff] }
 0x213   : > { %3594 = vmatprep.mubr.msk.f32.mxu0 %vm1834_vm1, %v1771_v36  ;;  %v1776_v8 = vmax.f32 %v1542_v43, 0.0  ;;  %v3862_v36 = vpack.c.bf16 %v2483_v34, %v2482_v33 }
 0x214   : > { %v1546_v4 = vpop.f32.mrb[30].mxu1 }
 0x215   : > { %v1548_v9 = vpop.f32.mrb[31].mxu1  ;;  %v1547_v46 = vadd.f32 %v4545_v2, %v1546_v4  ;;  %3863 = vmatprep.subr.bf16.mxu1 %v3862_v36 }
 0x216   : > { %3595 = vmatmul.mubr.msk.f32.gmra.mrb[158].mxu0 %vm1834_vm1, %v1772_v39  ;;  %3865 = vmatpush3.bf16.msra.mxu1 %v3862_v36 }
 0x217   : > { %3597 = vmatprep.mubr.msk.f32.mxu0 %vm1834_vm1, %v1773_v7  ;;  %v1777_v50 = vmax.f32 %v1547_v46, 0.0 }
 0x218   : > { %v1551_v44 = vpop.f32.mrb[32].mxu1 }
 0x219   : > { %v1553_v47 = vpop.f32.mrb[33].mxu1  ;;  %v1552_v48 = vadd.f32 %v4545_v2, %v1551_v44 }
 0x21a   : > { %3598 = vmatmul.mubr.msk.f32.gmra.mrb[160].mxu0 %vm1834_vm1, %v1774_v42 }
 0x21b   : > { %3600 = vmatprep.mubr.msk.f32.mxu0 %vm1834_vm1, %v1775_v45  ;;  %v1778_v53 = vmax.f32 %v1552_v48, 0.0 }
 0x21c   : > { %v1556_v49 = vpop.f32.mrb[34].mxu1 }
 0x21d   : > { %v1557_v51 = vadd.f32 %v4545_v2, %v1556_v49  ;;  %v1558_v52 = vpop.f32.mrb[35].mxu1 }
 0x21e   : > { %3601 = vmatmul.mubr.msk.f32.gmra.mrb[162].mxu0 %vm1834_vm1, %v1776_v8 }
 0x21f   : > { %3603 = vmatprep.mubr.msk.f32.mxu0 %vm1834_vm1, %v1777_v50  ;;  %v1779_v55 = vmax.f32 %v1557_v51, 0.0 }
 0x220   : > { %v1561_v54 = vpop.f32.mrb[36].mxu1 }
 0x221   : > { %v1562_v57 = vadd.f32 %v4545_v2, %v1561_v54  ;;  %v1563_v58 = vpop.f32.mrb[37].mxu1 }
 0x222   : > { %3604 = vmatmul.mubr.msk.f32.gmra.mrb[164].mxu0 %vm1834_vm1, %v1778_v53 }
 0x223   : > { %v1780_v61 = vmax.f32 %v1562_v57, 0.0  ;;  %3606 = vmatprep.mubr.msk.f32.mxu0 %vm1834_vm1, %v1779_v55 }
 0x224   : > { %v1566_v0 = vpop.f32.mrb[38].mxu1 }
 0x225   : > { %v1567_v56 = vadd.f32 %v4545_v2, %v1566_v0  ;;  %v1568_v3 = vpop.f32.mrb[39].mxu1 }
 0x226   : > { %3607 = vmatmul.mubr.msk.f32.gmra.mrb[166].mxu0 %vm1834_vm1, %v1780_v61 }
 0x227   : > { %v1781_v6 = vmax.f32 %v1567_v56, 0.0 }
 0x228   : > { %v1571_v60 = vpop.f32.mrb[40].mxu1 }
 0x229   : > { %v1572_v11 = vadd.f32 %v4545_v2, %v1571_v60  ;;  %v1573_v12 = vpop.f32.mrb[41].mxu1  ;;  %3609 = vmatprep.mubr.msk.f32.mxu0 %vm1834_vm1, %v1781_v6 }
 0x22b   : > { %v1782_v14 = vmax.f32 %v1572_v11, 0.0 }
 0x22c   : > { %v1576_v59 = vpop.f32.mrb[42].mxu1 }
 0x22d   : > { %v1577_v19 = vadd.f32 %v4545_v2, %v1576_v59  ;;  %v1578_v10 = vpop.f32.mrb[43].mxu1  ;;  %3610 = vmatmul.mubr.msk.f32.gmra.mrb[168].mxu0 %vm1834_vm1, %v1782_v14 }
 0x22f   : > { %v1783_v63 = vmax.f32 %v1577_v19, 0.0 }
 0x230   : > { %v1581_v17 = vpop.f32.mrb[44].mxu1 }
 0x231   : > { %v1582_v20 = vadd.f32 %v4545_v2, %v1581_v17  ;;  %v1583_v21 = vpop.f32.mrb[45].mxu1  ;;  %3612 = vmatprep.mubr.msk.f32.mxu0 %vm1834_vm1, %v1783_v63 }
 0x233   : > { %v1784_v22 = vmax.f32 %v1582_v20, 0.0 }
 0x234   : > { %v1586_v23 = vpop.f32.mrb[46].mxu1 }
 0x235   : > { %v1587_v62 = vadd.f32 %v4545_v2, %v1586_v23  ;;  %v1588_v24 = vpop.f32.mrb[47].mxu1  ;;  %3613 = vmatmul.mubr.msk.f32.gmra.mrb[170].mxu0 %vm1834_vm1, %v1784_v22 }
 0x237   : > { %v1785_v25 = vmax.f32 %v1587_v62, 0.0 }
 0x238   : > { %v1591_v26 = vpop.f32.mrb[48].mxu1 }
 0x239   : > { %v1592_v27 = vadd.f32 %v4545_v2, %v1591_v26  ;;  %v1593_v28 = vpop.f32.mrb[49].mxu1  ;;  %3615 = vmatprep.mubr.msk.f32.mxu0 %vm1834_vm1, %v1785_v25 }
 0x23b   : > { %v1786_v29 = vmax.f32 %v1592_v27, 0.0 }
 0x23c   : > { %v1596_v30 = vpop.f32.mrb[50].mxu1 }
 0x23d   : > { %v1597_v13 = vadd.f32 %v4545_v2, %v1596_v30  ;;  %v1598_v31 = vpop.f32.mrb[51].mxu1  ;;  %3616 = vmatmul.mubr.msk.f32.gmra.mrb[172].mxu0 %vm1834_vm1, %v1786_v29 }
 0x23f   : > { %v1787_v1 = vmax.f32 %v1597_v13, 0.0 }
 0x240   : > { %v1601_v32 = vpop.f32.mrb[52].mxu1 }
 0x241   : > { %v1602_v35 = vadd.f32 %v4545_v2, %v1601_v32  ;;  %v1603_v5 = vpop.f32.mrb[53].mxu1  ;;  %3618 = vmatprep.mubr.msk.f32.mxu0 %vm1834_vm1, %v1787_v1 }
 0x243   : > { %v1788_v37 = vmax.f32 %v1602_v35, 0.0 }
 0x244   : > { %v1606_v38 = vpop.f32.mrb[54].mxu1 }
 0x245   : > { %v1607_v39 = vadd.f32 %v4545_v2, %v1606_v38  ;;  %v1608_v40 = vpop.f32.mrb[55].mxu1  ;;  %3619 = vmatmul.mubr.msk.f32.gmra.mrb[174].mxu0 %vm1834_vm1, %v1788_v37 }
 0x247   : > { %v1789_v4 = vmax.f32 %v1607_v39, 0.0 }
 0x248   : > { %v1611_v7 = vpop.f32.mrb[56].mxu1 }
 0x249   : > { %v1612_v41 = vadd.f32 %v4545_v2, %v1611_v7  ;;  %v1613_v9 = vpop.f32.mrb[57].mxu1  ;;  %3621 = vmatprep.mubr.msk.f32.mxu0 %vm1834_vm1, %v1789_v4 }
 0x24b   : > { %v1790_v42 = vmax.f32 %v1612_v41, 0.0 }
 0x24c   : > { %v1616_v43 = vpop.f32.mrb[58].mxu1 }
 0x24d   : > { %v1617_v44 = vadd.f32 %v4545_v2, %v1616_v43  ;;  %v1618_v45 = vpop.f32.mrb[59].mxu1  ;;  %3622 = vmatmul.mubr.msk.f32.gmra.mrb[176].mxu0 %vm1834_vm1, %v1790_v42 }
 0x24f   : > { %v1791_v46 = vmax.f32 %v1617_v44, 0.0 }
 0x250   : > { %v1621_v47 = vpop.f32.mrb[60].mxu1 }
 0x251   : > { %v1622_v8 = vadd.f32 %v4545_v2, %v1621_v47  ;;  %v1623_v48 = vpop.f32.mrb[61].mxu1  ;;  %3624 = vmatprep.mubr.msk.f32.mxu0 %vm1834_vm1, %v1791_v46 }
 0x253   : > { %v1792_v49 = vmax.f32 %v1622_v8, 0.0 }
 0x254   : > { %v1626_v50 = vpop.f32.mrb[62].mxu1 }
 0x255   : > { %v1627_v51 = vadd.f32 %v4545_v2, %v1626_v50  ;;  %v1628_v52 = vpop.f32.mrb[63].mxu1  ;;  %3625 = vmatmul.mubr.msk.f32.gmra.mrb[178].mxu0 %vm1834_vm1, %v1792_v49 }
 0x257   : > { %v1793_v53 = vmax.f32 %v1627_v51, 0.0 }
 0x258   : > { %v1631_v54 = vpop.f32.mrb[64].mxu1 }
 0x259   : > { %v1632_v55 = vadd.f32 %v4545_v2, %v1631_v54  ;;  %v1633_v57 = vpop.f32.mrb[65].mxu1  ;;  %3627 = vmatprep.mubr.msk.f32.mxu0 %vm1834_vm1, %v1793_v53 }
 0x25b   : > { %v1794_v58 = vmax.f32 %v1632_v55, 0.0 }
 0x25c   : > { %v1636_v61 = vpop.f32.mrb[66].mxu1 }
 0x25d   : > { %v1637_v0 = vadd.f32 %v4545_v2, %v1636_v61  ;;  %v1638_v56 = vpop.f32.mrb[67].mxu1  ;;  %3628 = vmatmul.mubr.msk.f32.gmra.mrb[180].mxu0 %vm1834_vm1, %v1794_v58 }
 0x25f   : > { %v1795_v3 = vmax.f32 %v1637_v0, 0.0 }
 0x260   : > { %v1641_v6 = vpop.f32.mrb[68].mxu1 }
 0x261   : > { %v1642_v60 = vadd.f32 %v4545_v2, %v1641_v6  ;;  %v1643_v11 = vpop.f32.mrb[69].mxu1  ;;  %3630 = vmatprep.mubr.msk.f32.mxu0 %vm1834_vm1, %v1795_v3 }
 0x263   : > { %v1796_v12 = vmax.f32 %v1642_v60, 0.0 }
 0x264   : > { %v1646_v14 = vpop.f32.mrb[70].mxu1 }
 0x265   : > { %v1647_v15 = vadd.f32 %v4545_v2, %v1646_v14  ;;  %v1648_v16 = vpop.f32.mrb[71].mxu1  ;;  %3631 = vmatmul.mubr.msk.f32.gmra.mrb[182].mxu0 %vm1834_vm1, %v1796_v12 }
 0x267   : > { %v1797_v59 = vmax.f32 %v1647_v15, 0.0 }
 0x268   : > { %v1651_v18 = vpop.f32.mrb[72].mxu1 }
 0x269   : > { %v1652_v19 = vadd.f32 %v4545_v2, %v1651_v18  ;;  %v1653_v10 = vpop.f32.mrb[73].mxu1  ;;  %3633 = vmatprep.mubr.msk.f32.mxu0 %vm1834_vm1, %v1797_v59 }
 0x26b   : > { %v1798_v63 = vmax.f32 %v1652_v19, 0.0 }
 0x26c   : > { %v1656_v17 = vpop.f32.mrb[74].mxu1 }
 0x26d   : > { %v1657_v20 = vadd.f32 %v4545_v2, %v1656_v17  ;;  %v1658_v21 = vpop.f32.mrb[75].mxu1  ;;  %3634 = vmatmul.mubr.msk.f32.gmra.mrb[184].mxu0 %vm1834_vm1, %v1798_v63 }
 0x26f   : > { %v1799_v22 = vmax.f32 %v1657_v20, 0.0 }
 0x270   : > { %v1661_v23 = vpop.f32.mrb[76].mxu1 }
 0x271   : > { %v1662_v62 = vadd.f32 %v4545_v2, %v1661_v23  ;;  %v1663_v24 = vpop.f32.mrb[77].mxu1  ;;  %3636 = vmatprep.mubr.msk.f32.mxu0 %vm1834_vm1, %v1799_v22 }
 0x273   : > { %v1800_v25 = vmax.f32 %v1662_v62, 0.0 }
 0x274   : > { %v1666_v26 = vpop.f32.mrb[78].mxu1 }
 0x275   : > { %v1667_v27 = vadd.f32 %v4545_v2, %v1666_v26  ;;  %v1668_v28 = vpop.f32.mrb[79].mxu1  ;;  %3637 = vmatmul.mubr.msk.f32.gmra.mrb[186].mxu0 %vm1834_vm1, %v1800_v25 }
 0x277   : > { %v1801_v29 = vmax.f32 %v1667_v27, 0.0 }
 0x278   : > { %v1671_v30 = vpop.f32.mrb[80].mxu1 }
 0x279   : > { %v1672_v13 = vadd.f32 %v4545_v2, %v1671_v30  ;;  %v1673_v31 = vpop.f32.mrb[81].mxu1  ;;  %3639 = vmatprep.mubr.msk.f32.mxu0 %vm1834_vm1, %v1801_v29 }
 0x27b   : > { %v1802_v1 = vmax.f32 %v1672_v13, 0.0 }
 0x27c   : > { %v1676_v32 = vpop.f32.mrb[82].mxu1 }
 0x27d   : > { %v1677_v33 = vadd.f32 %v4545_v2, %v1676_v32  ;;  %v1678_v34 = vpop.f32.mrb[83].mxu1  ;;  %3640 = vmatmul.mubr.msk.f32.gmra.mrb[188].mxu0 %vm1834_vm1, %v1802_v1 }
 0x27f   : > { %v1803_v35 = vmax.f32 %v1677_v33, 0.0  ;;  %v4699_v33 = vld [vmem:[%s4978_s6] ss:$0 sm:$0xff] }
 0x280   : > { %v1681_v5 = vpop.f32.mrb[84].mxu1 }
 0x281   : > { %v1682_v36 = vadd.f32 %v4545_v2, %v1681_v5  ;;  %v1683_v37 = vpop.f32.mrb[85].mxu1  ;;  %3642 = vmatprep.mubr.msk.f32.mxu0 %vm1834_vm1, %v1803_v35 }
 0x283   : > { %v1804_v38 = vmax.f32 %v1682_v36, 0.0 }
 0x284   : > { %v1686_v39 = vpop.f32.mrb[86].mxu1 }
 0x285   : > { %v1687_v40 = vadd.f32 %v4545_v2, %v1686_v39  ;;  %v1688_v4 = vpop.f32.mrb[87].mxu1  ;;  %3643 = vmatmul.mubr.msk.f32.gmra.mrb[190].mxu0 %vm1834_vm1, %v1804_v38 }
 0x287   : > { %v1805_v7 = vmax.f32 %v1687_v40, 0.0 }
 0x288   : > { %v1691_v41 = vpop.f32.mrb[88].mxu1 }
 0x289   : > { %v1692_v9 = vadd.f32 %v4545_v2, %v1691_v41  ;;  %v1693_v42 = vpop.f32.mrb[89].mxu1  ;;  %3645 = vmatprep.mubr.msk.f32.mxu0 %vm1834_vm1, %v1805_v7 }
 0x28b   : > { %v1806_v43 = vmax.f32 %v1692_v9, 0.0 }
 0x28c   : > { %v1696_v44 = vpop.f32.mrb[90].mxu1 }
 0x28d   : > { %v1697_v45 = vadd.f32 %v4545_v2, %v1696_v44  ;;  %v1698_v46 = vpop.f32.mrb[91].mxu1  ;;  %3646 = vmatmul.mubr.msk.f32.gmra.mrb[192].mxu0 %vm1834_vm1, %v1806_v43 }
 0x28f   : > { %v1807_v47 = vmax.f32 %v1697_v45, 0.0 }
 0x290   : > { %v1701_v8 = vpop.f32.mrb[92].mxu1 }
 0x291   : > { %v1702_v48 = vadd.f32 %v4545_v2, %v1701_v8  ;;  %v1703_v49 = vpop.f32.mrb[93].mxu1  ;;  %3648 = vmatprep.mubr.msk.f32.mxu0 %vm1834_vm1, %v1807_v47 }
 0x293   : > { %v1808_v50 = vmax.f32 %v1702_v48, 0.0 }
 0x294   : > { %v1706_v51 = vpop.f32.mrb[94].mxu1 }
 0x295   : > { %v1707_v52 = vadd.f32 %v4545_v2, %v1706_v51  ;;  %v1708_v53 = vpop.f32.mrb[95].mxu1  ;;  %3649 = vmatmul.mubr.msk.f32.gmra.mrb[194].mxu0 %vm1834_vm1, %v1808_v50 }
 0x297   : > { %v1809_v54 = vmax.f32 %v1707_v52, 0.0 }
 0x298   : > { %v1711_v55 = vpop.f32.mrb[96].mxu1 }
 0x299   : > { %v1712_v57 = vadd.f32 %v4545_v2, %v1711_v55  ;;  %v1713_v58 = vpop.f32.mrb[97].mxu1  ;;  %3651 = vmatprep.mubr.msk.f32.mxu0 %vm1834_vm1, %v1809_v54 }
 0x29b   : > { %v1810_v61 = vmax.f32 %v1712_v57, 0.0 }
 0x29c   : > { %v1716_v0 = vpop.f32.mrb[98].mxu1 }
 0x29d   : > { %v1717_v56 = vadd.f32 %v4545_v2, %v1716_v0  ;;  %v1718_v3 = vpop.f32.mrb[99].mxu1  ;;  %3652 = vmatmul.mubr.msk.f32.gmra.mrb[196].mxu0 %vm1834_vm1, %v1810_v61 }
 0x29f   : > { %v1811_v6 = vmax.f32 %v1717_v56, 0.0 }
 0x2a0   : > { %v1721_v60 = vpop.f32.mrb[100].mxu1 }
 0x2a1   : > { %v1722_v11 = vadd.f32 %v4545_v2, %v1721_v60  ;;  %v1723_v12 = vpop.f32.mrb[101].mxu1  ;;  %3654 = vmatprep.mubr.msk.f32.mxu0 %vm1834_vm1, %v1811_v6 }
 0x2a3   : > { %v1812_v14 = vmax.f32 %v1722_v11, 0.0 }
 0x2a4   : > { %v1726_v15 = vpop.f32.mrb[102].mxu1 }
 0x2a5   : > { %v1727_v16 = vadd.f32 %v4545_v2, %v1726_v15  ;;  %v1728_v59 = vpop.f32.mrb[103].mxu1  ;;  %3655 = vmatmul.mubr.msk.f32.gmra.mrb[198].mxu0 %vm1834_vm1, %v1812_v14 }
 0x2a7   : > { %v1813_v18 = vmax.f32 %v1727_v16, 0.0 }
 0x2a8   : > { %v1731_v19 = vpop.f32.mrb[104].mxu1 }
 0x2a9   : > { %v1732_v10 = vadd.f32 %v4545_v2, %v1731_v19  ;;  %v1733_v63 = vpop.f32.mrb[105].mxu1  ;;  %3657 = vmatprep.mubr.msk.f32.mxu0 %vm1834_vm1, %v1813_v18 }
 0x2ab   : > { %v1814_v17 = vmax.f32 %v1732_v10, 0.0 }
 0x2ac   : > { %v1736_v20 = vpop.f32.mrb[106].mxu1 }
 0x2ad   : > { %v1737_v21 = vadd.f32 %v4545_v2, %v1736_v20  ;;  %v1738_v22 = vpop.f32.mrb[107].mxu1  ;;  %3658 = vmatmul.mubr.msk.f32.gmra.mrb[200].mxu0 %vm1834_vm1, %v1814_v17 }
 0x2af   : > { %v1815_v23 = vmax.f32 %v1737_v21, 0.0 }
 0x2b0   : > { %v1741_v62 = vpop.f32.mrb[108].mxu1 }
 0x2b1   : > { %v1742_v24 = vadd.f32 %v4545_v2, %v1741_v62  ;;  %v1743_v25 = vpop.f32.mrb[109].mxu1  ;;  %3660 = vmatprep.mubr.msk.f32.mxu0 %vm1834_vm1, %v1815_v23 }
 0x2b3   : > { %v1816_v26 = vmax.f32 %v1742_v24, 0.0 }
 0x2b4   : > { %v1746_v27 = vpop.f32.mrb[110].mxu1 }
 0x2b5   : > { %v1747_v28 = vadd.f32 %v4545_v2, %v1746_v27  ;;  %v1748_v29 = vpop.f32.mrb[111].mxu1  ;;  %3661 = vmatmul.mubr.msk.f32.gmra.mrb[202].mxu0 %vm1834_vm1, %v1816_v26 }
 0x2b7   : > { %v1817_v30 = vmax.f32 %v1747_v28, 0.0 }
 0x2b8   : > { %v1751_v13 = vpop.f32.mrb[112].mxu1 }
 0x2b9   : > { %v1752_v31 = vadd.f32 %v4545_v2, %v1751_v13  ;;  %v1753_v1 = vpop.f32.mrb[113].mxu1  ;;  %3663 = vmatprep.mubr.msk.f32.mxu0 %vm1834_vm1, %v1817_v30 }
 0x2bb   : > { %v1818_v32 = vmax.f32 %v1752_v31, 0.0 }
 0x2bd   : > { %3664 = vmatmul.mubr.msk.f32.gmra.mrb[204].mxu0 %vm1834_vm1, %v1818_v32 }
 0x2c0   : > { %v3572_v34 = vpop.f32.mrb[142].mxu0 }
 0x2c1   : > { %v2099_v35 = vadd.f32 %v3572_v34, %v4699_v33  ;;  %v2093_v5 = vpop.f32.mrb[143].mxu0 }
 0x2c2   : > { %v2094_v36 = vadd.f32 %v4699_v33, %v2093_v5 }
 0x2c3   : > { %v2413_v38 = vmax.f32 %v2099_v35, 0.0 }
 0x2c4   : > { %v2412_v37 = vmax.f32 %v2094_v36, 0.0 }
 0x2c6   : > { %3682 = vmatprep.mubr.msk.f32.mxu1 %vm1834_vm1, %v2412_v37 }
 0x2c7   : > { %3683 = vmatmul.mubr.msk.f32.vlgmr.msra.gmra.mrb[114].mxu1 %vm1834_vm1, %v2413_v38 }
 0x2c8   : > { %v3575_v2 = vpop.f32.mrb[144].mxu0 }
 0x2c9   : > { %v2109_v39 = vadd.f32 %v3575_v2, %v4699_v33  ;;  %v2103_v40 = vpop.f32.mrb[145].mxu0 }
 0x2ca   : > { %v2104_v4 = vadd.f32 %v4699_v33, %v2103_v40 }
 0x2cb   : > { %v2415_v41 = vmax.f32 %v2109_v39, 0.0 }
 0x2cc   : > { %v2414_v7 = vmax.f32 %v2104_v4, 0.0 }
 0x2ce   : > { %3685 = vmatprep.mubr.msk.f32.mxu1 %vm1834_vm1, %v2414_v7 }
 0x2cf   : > { %3686 = vmatmul.mubr.msk.f32.gmra.mrb[116].mxu1 %vm1834_vm1, %v2415_v41 }
 0x2d0   : > { %v3578_v9 = vpop.f32.mrb[146].mxu0 }
 0x2d1   : > { %v2119_v42 = vadd.f32 %v3578_v9, %v4699_v33  ;;  %v2113_v43 = vpop.f32.mrb[147].mxu0 }
 0x2d2   : > { %v2114_v44 = vadd.f32 %v4699_v33, %v2113_v43 }
 0x2d3   : > { %v2417_v46 = vmax.f32 %v2119_v42, 0.0 }
 0x2d4   : > { %v2416_v45 = vmax.f32 %v2114_v44, 0.0 }
 0x2d5   : > { %v3581_v47 = vpop.f32.mrb[148].mxu0 }
 0x2d6   : > { %v2129_v8 = vadd.f32 %v3581_v47, %v4699_v33  ;;  %v2123_v48 = vpop.f32.mrb[149].mxu0  ;;  %3688 = vmatprep.mubr.msk.f32.mxu1 %vm1834_vm1, %v2416_v45 }
 0x2d7   : > { %v2124_v49 = vadd.f32 %v4699_v33, %v2123_v48  ;;  %3689 = vmatmul.mubr.msk.f32.gmra.mrb[118].mxu1 %vm1834_vm1, %v2417_v46 }
 0x2d8   : > { %v2419_v52 = vmax.f32 %v2129_v8, 0.0 }
 0x2d9   : > { %v2418_v50 = vmax.f32 %v2124_v49, 0.0  ;;  %v3584_v51 = vpop.f32.mrb[150].mxu0 }
 0x2da   : > { %v2139_v53 = vadd.f32 %v3584_v51, %v4699_v33  ;;  %v2133_v54 = vpop.f32.mrb[151].mxu0 }
 0x2db   : > { %v2134_v55 = vadd.f32 %v4699_v33, %v2133_v54  ;;  %3691 = vmatprep.mubr.msk.f32.mxu1 %vm1834_vm1, %v2418_v50 }
 0x2dc   : > { %3692 = vmatmul.mubr.msk.f32.gmra.mrb[120].mxu1 %vm1834_vm1, %v2419_v52  ;;  %v2421_v61 = vmax.f32 %v2139_v53, 0.0 }
 0x2dd   : > { %v2420_v57 = vmax.f32 %v2134_v55, 0.0  ;;  %v3587_v58 = vpop.f32.mrb[152].mxu0 }
 0x2de   : > { %v2149_v0 = vadd.f32 %v3587_v58, %v4699_v33  ;;  %v2143_v56 = vpop.f32.mrb[153].mxu0 }
 0x2df   : > { %v2144_v3 = vadd.f32 %v4699_v33, %v2143_v56  ;;  %3694 = vmatprep.mubr.msk.f32.mxu1 %vm1834_vm1, %v2420_v57 }
 0x2e0   : > { %3695 = vmatmul.mubr.msk.f32.gmra.mrb[122].mxu1 %vm1834_vm1, %v2421_v61  ;;  %v2423_v11 = vmax.f32 %v2149_v0, 0.0 }
 0x2e1   : > { %v2422_v6 = vmax.f32 %v2144_v3, 0.0  ;;  %v3590_v60 = vpop.f32.mrb[154].mxu0 }
 0x2e2   : > { %v2159_v12 = vadd.f32 %v3590_v60, %v4699_v33  ;;  %v2153_v14 = vpop.f32.mrb[155].mxu0 }
 0x2e3   : > { %v2154_v15 = vadd.f32 %v4699_v33, %v2153_v14  ;;  %3697 = vmatprep.mubr.msk.f32.mxu1 %vm1834_vm1, %v2422_v6 }
 0x2e4   : > { %3698 = vmatmul.mubr.msk.f32.gmra.mrb[124].mxu1 %vm1834_vm1, %v2423_v11  ;;  %v2425_v18 = vmax.f32 %v2159_v12, 0.0 }
 0x2e5   : > { %v2424_v16 = vmax.f32 %v2154_v15, 0.0  ;;  %v3593_v59 = vpop.f32.mrb[156].mxu0 }
 0x2e6   : > { %v2169_v19 = vadd.f32 %v3593_v59, %v4699_v33  ;;  %v2163_v10 = vpop.f32.mrb[157].mxu0 }
 0x2e7   : > { %v2164_v63 = vadd.f32 %v4699_v33, %v2163_v10  ;;  %3700 = vmatprep.mubr.msk.f32.mxu1 %vm1834_vm1, %v2424_v16 }
 0x2e8   : > { %3701 = vmatmul.mubr.msk.f32.gmra.mrb[126].mxu1 %vm1834_vm1, %v2425_v18  ;;  %v2427_v21 = vmax.f32 %v2169_v19, 0.0 }
 0x2e9   : > { %v2426_v17 = vmax.f32 %v2164_v63, 0.0  ;;  %v3596_v20 = vpop.f32.mrb[158].mxu0 }
 0x2ea   : > { %v2179_v22 = vadd.f32 %v3596_v20, %v4699_v33  ;;  %v2173_v23 = vpop.f32.mrb[159].mxu0 }
 0x2eb   : > { %v2174_v62 = vadd.f32 %v4699_v33, %v2173_v23  ;;  %3703 = vmatprep.mubr.msk.f32.mxu1 %vm1834_vm1, %v2426_v17 }
 0x2ec   : > { %3704 = vmatmul.mubr.msk.f32.gmra.mrb[128].mxu1 %vm1834_vm1, %v2427_v21  ;;  %v2429_v26 = vmax.f32 %v2179_v22, 0.0 }
 0x2ed   : > { %v2428_v24 = vmax.f32 %v2174_v62, 0.0  ;;  %v3599_v25 = vpop.f32.mrb[160].mxu0 }
 0x2ee   : > { %v2189_v27 = vadd.f32 %v3599_v25, %v4699_v33  ;;  %v2183_v28 = vpop.f32.mrb[161].mxu0 }
 0x2ef   : > { %v2184_v29 = vadd.f32 %v4699_v33, %v2183_v28  ;;  %3706 = vmatprep.mubr.msk.f32.mxu1 %vm1834_vm1, %v2428_v24 }
 0x2f0   : > { %3707 = vmatmul.mubr.msk.f32.gmra.mrb[130].mxu1 %vm1834_vm1, %v2429_v26  ;;  %v2431_v31 = vmax.f32 %v2189_v27, 0.0 }
 0x2f1   : > { %v2430_v30 = vmax.f32 %v2184_v29, 0.0  ;;  %v3602_v13 = vpop.f32.mrb[162].mxu0 }
 0x2f2   : > { %v2199_v1 = vadd.f32 %v3602_v13, %v4699_v33  ;;  %v2193_v32 = vpop.f32.mrb[163].mxu0 }
 0x2f3   : > { %v2194_v34 = vadd.f32 %v4699_v33, %v2193_v32  ;;  %3709 = vmatprep.mubr.msk.f32.mxu1 %vm1834_vm1, %v2430_v30 }
 0x2f4   : > { %3710 = vmatmul.mubr.msk.f32.gmra.mrb[132].mxu1 %vm1834_vm1, %v2431_v31  ;;  %v2433_v36 = vmax.f32 %v2199_v1, 0.0 }
 0x2f5   : > { %v2432_v35 = vmax.f32 %v2194_v34, 0.0  ;;  %v3605_v5 = vpop.f32.mrb[164].mxu0 }
 0x2f6   : > { %v2209_v37 = vadd.f32 %v3605_v5, %v4699_v33  ;;  %v2203_v38 = vpop.f32.mrb[165].mxu0 }
 0x2f7   : > { %v2204_v2 = vadd.f32 %v4699_v33, %v2203_v38  ;;  %3712 = vmatprep.mubr.msk.f32.mxu1 %vm1834_vm1, %v2432_v35 }
 0x2f8   : > { %3713 = vmatmul.mubr.msk.f32.gmra.mrb[134].mxu1 %vm1834_vm1, %v2433_v36  ;;  %v2435_v4 = vmax.f32 %v2209_v37, 0.0 }
 0x2f9   : > { %v2434_v39 = vmax.f32 %v2204_v2, 0.0  ;;  %v3608_v40 = vpop.f32.mrb[166].mxu0 }
 0x2fa   : > { %v2219_v7 = vadd.f32 %v3608_v40, %v4699_v33  ;;  %v2213_v41 = vpop.f32.mrb[167].mxu0 }
 0x2fb   : > { %v2214_v9 = vadd.f32 %v4699_v33, %v2213_v41  ;;  %3715 = vmatprep.mubr.msk.f32.mxu1 %vm1834_vm1, %v2434_v39 }
 0x2fc   : > { %3716 = vmatmul.mubr.msk.f32.gmra.mrb[136].mxu1 %vm1834_vm1, %v2435_v4  ;;  %v2437_v43 = vmax.f32 %v2219_v7, 0.0 }
 0x2fd   : > { %v2436_v42 = vmax.f32 %v2214_v9, 0.0 }
 0x2ff   : > { %3718 = vmatprep.mubr.msk.f32.mxu1 %vm1834_vm1, %v2436_v42 }
 0x300   : > { %v3611_v44 = vpop.f32.mrb[168].mxu0  ;;  %3719 = vmatmul.mubr.msk.f32.gmra.mrb[138].mxu1 %vm1834_vm1, %v2437_v43 }
 0x301   : > { %v2229_v45 = vadd.f32 %v3611_v44, %v4699_v33  ;;  %v2223_v46 = vpop.f32.mrb[169].mxu0 }
 0x302   : > { %v2224_v47 = vadd.f32 %v4699_v33, %v2223_v46 }
 0x303   : > { %v2439_v48 = vmax.f32 %v2229_v45, 0.0 }
 0x304   : > { %v2438_v8 = vmax.f32 %v2224_v47, 0.0 }
 0x306   : > { %3721 = vmatprep.mubr.msk.f32.mxu1 %vm1834_vm1, %v2438_v8 }
 0x307   : > { %3722 = vmatmul.mubr.msk.f32.gmra.mrb[140].mxu1 %vm1834_vm1, %v2439_v48 }
 0x308   : > { %v3614_v49 = vpop.f32.mrb[170].mxu0 }
 0x309   : > { %v2239_v50 = vadd.f32 %v3614_v49, %v4699_v33  ;;  %v2233_v51 = vpop.f32.mrb[171].mxu0 }
 0x30a   : > { %v2234_v52 = vadd.f32 %v4699_v33, %v2233_v51 }
 0x30b   : > { %v2441_v54 = vmax.f32 %v2239_v50, 0.0 }
 0x30c   : > { %v2440_v53 = vmax.f32 %v2234_v52, 0.0 }
 0x30e   : > { %3724 = vmatprep.mubr.msk.f32.mxu1 %vm1834_vm1, %v2440_v53 }
 0x30f   : > { %3725 = vmatmul.mubr.msk.f32.gmra.mrb[142].mxu1 %vm1834_vm1, %v2441_v54 }
 0x310   : > { %v3617_v55 = vpop.f32.mrb[172].mxu0 }
 0x311   : > { %v2249_v57 = vadd.f32 %v3617_v55, %v4699_v33  ;;  %v2243_v58 = vpop.f32.mrb[173].mxu0 }
 0x312   : > { %v2244_v61 = vadd.f32 %v4699_v33, %v2243_v58 }
 0x313   : > { %v2443_v56 = vmax.f32 %v2249_v57, 0.0 }
 0x314   : > { %v2442_v0 = vmax.f32 %v2244_v61, 0.0 }
 0x316   : > { %3727 = vmatprep.mubr.msk.f32.mxu1 %vm1834_vm1, %v2442_v0 }
 0x317   : > { %3728 = vmatmul.mubr.msk.f32.gmra.mrb[144].mxu1 %vm1834_vm1, %v2443_v56 }
 0x318   : > { %v3620_v3 = vpop.f32.mrb[174].mxu0 }
 0x319   : > { %v2259_v6 = vadd.f32 %v3620_v3, %v4699_v33  ;;  %v2253_v60 = vpop.f32.mrb[175].mxu0 }
 0x31a   : > { %v2254_v11 = vadd.f32 %v4699_v33, %v2253_v60 }
 0x31b   : > { %v2445_v14 = vmax.f32 %v2259_v6, 0.0 }
 0x31c   : > { %v2444_v12 = vmax.f32 %v2254_v11, 0.0 }
 0x31e   : > { %3730 = vmatprep.mubr.msk.f32.mxu1 %vm1834_vm1, %v2444_v12 }
 0x31f   : > { %3731 = vmatmul.mubr.msk.f32.gmra.mrb[146].mxu1 %vm1834_vm1, %v2445_v14 }
 0x320   : > { %v3623_v15 = vpop.f32.mrb[176].mxu0 }
 0x321   : > { %v2269_v16 = vadd.f32 %v3623_v15, %v4699_v33  ;;  %v2263_v59 = vpop.f32.mrb[177].mxu0 }
 0x322   : > { %v2264_v18 = vadd.f32 %v4699_v33, %v2263_v59 }
 0x323   : > { %v2447_v10 = vmax.f32 %v2269_v16, 0.0 }
 0x324   : > { %v2446_v19 = vmax.f32 %v2264_v18, 0.0 }
 0x326   : > { %3733 = vmatprep.mubr.msk.f32.mxu1 %vm1834_vm1, %v2446_v19 }
 0x327   : > { %3734 = vmatmul.mubr.msk.f32.gmra.mrb[148].mxu1 %vm1834_vm1, %v2447_v10 }
 0x328   : > { %v3626_v63 = vpop.f32.mrb[178].mxu0 }
 0x329   : > { %v2279_v17 = vadd.f32 %v3626_v63, %v4699_v33  ;;  %v2273_v20 = vpop.f32.mrb[179].mxu0 }
 0x32a   : > { %v2274_v21 = vadd.f32 %v4699_v33, %v2273_v20 }
 0x32b   : > { %v2449_v23 = vmax.f32 %v2279_v17, 0.0 }
 0x32c   : > { %v2448_v22 = vmax.f32 %v2274_v21, 0.0 }
 0x32e   : > { %3736 = vmatprep.mubr.msk.f32.mxu1 %vm1834_vm1, %v2448_v22 }
 0x32f   : > { %3737 = vmatmul.mubr.msk.f32.gmra.mrb[150].mxu1 %vm1834_vm1, %v2449_v23 }
 0x330   : > { %v3629_v62 = vpop.f32.mrb[180].mxu0 }
 0x331   : > { %v2289_v24 = vadd.f32 %v3629_v62, %v4699_v33  ;;  %v2283_v25 = vpop.f32.mrb[181].mxu0 }
 0x332   : > { %v2284_v26 = vadd.f32 %v4699_v33, %v2283_v25 }
 0x333   : > { %v2451_v28 = vmax.f32 %v2289_v24, 0.0 }
 0x334   : > { %v2450_v27 = vmax.f32 %v2284_v26, 0.0 }
 0x336   : > { %3739 = vmatprep.mubr.msk.f32.mxu1 %vm1834_vm1, %v2450_v27 }
 0x337   : > { %3740 = vmatmul.mubr.msk.f32.gmra.mrb[152].mxu1 %vm1834_vm1, %v2451_v28 }
 0x338   : > { %v3632_v29 = vpop.f32.mrb[182].mxu0 }
 0x339   : > { %v2299_v30 = vadd.f32 %v3632_v29, %v4699_v33  ;;  %v2293_v13 = vpop.f32.mrb[183].mxu0 }
 0x33a   : > { %v2294_v31 = vadd.f32 %v4699_v33, %v2293_v13 }
 0x33b   : > { %v2453_v32 = vmax.f32 %v2299_v30, 0.0 }
 0x33c   : > { %v2452_v1 = vmax.f32 %v2294_v31, 0.0 }
 0x33e   : > { %3742 = vmatprep.mubr.msk.f32.mxu1 %vm1834_vm1, %v2452_v1 }
 0x33f   : > { %3743 = vmatmul.mubr.msk.f32.gmra.mrb[154].mxu1 %vm1834_vm1, %v2453_v32 }
 0x340   : > { %v3635_v34 = vpop.f32.mrb[184].mxu0 }
 0x341   : > { %v2309_v35 = vadd.f32 %v3635_v34, %v4699_v33  ;;  %v2303_v5 = vpop.f32.mrb[185].mxu0 }
 0x342   : > { %v2304_v36 = vadd.f32 %v4699_v33, %v2303_v5 }
 0x343   : > { %v2455_v38 = vmax.f32 %v2309_v35, 0.0 }
 0x344   : > { %v2454_v37 = vmax.f32 %v2304_v36, 0.0  ;;  %v4832_v36 = vld [vmem:[%s4980_s8] ss:$0 sm:$0xff] }
 0x346   : > { %3745 = vmatprep.mubr.msk.f32.mxu1 %vm1834_vm1, %v2454_v37 }
 0x347   : > { %3746 = vmatmul.mubr.msk.f32.gmra.mrb[156].mxu1 %vm1834_vm1, %v2455_v38 }
 0x348   : > { %v3638_v2 = vpop.f32.mrb[186].mxu0 }
 0x349   : > { %v2319_v39 = vadd.f32 %v3638_v2, %v4699_v33  ;;  %v2313_v40 = vpop.f32.mrb[187].mxu0 }
 0x34a   : > { %v2314_v4 = vadd.f32 %v4699_v33, %v2313_v40 }
 0x34b   : > { %v2457_v41 = vmax.f32 %v2319_v39, 0.0 }
 0x34c   : > { %v2456_v7 = vmax.f32 %v2314_v4, 0.0 }
 0x34e   : > { %3748 = vmatprep.mubr.msk.f32.mxu1 %vm1834_vm1, %v2456_v7 }
 0x34f   : > { %3749 = vmatmul.mubr.msk.f32.gmra.mrb[158].mxu1 %vm1834_vm1, %v2457_v41 }
 0x350   : > { %v3641_v9 = vpop.f32.mrb[188].mxu0 }
 0x351   : > { %v2329_v42 = vadd.f32 %v3641_v9, %v4699_v33  ;;  %v2323_v43 = vpop.f32.mrb[189].mxu0 }
 0x352   : > { %v2324_v44 = vadd.f32 %v4699_v33, %v2323_v43 }
 0x353   : > { %v2459_v46 = vmax.f32 %v2329_v42, 0.0 }
 0x354   : > { %v2458_v45 = vmax.f32 %v2324_v44, 0.0 }
 0x356   : > { %3751 = vmatprep.mubr.msk.f32.mxu1 %vm1834_vm1, %v2458_v45 }
 0x357   : > { %3752 = vmatmul.mubr.msk.f32.gmra.mrb[160].mxu1 %vm1834_vm1, %v2459_v46 }
 0x358   : > { %v3644_v47 = vpop.f32.mrb[190].mxu0 }
 0x359   : > { %v2339_v8 = vadd.f32 %v3644_v47, %v4699_v33  ;;  %v2333_v48 = vpop.f32.mrb[191].mxu0 }
 0x35a   : > { %v2334_v49 = vadd.f32 %v4699_v33, %v2333_v48 }
 0x35b   : > { %v2461_v51 = vmax.f32 %v2339_v8, 0.0 }
 0x35c   : > { %v2460_v50 = vmax.f32 %v2334_v49, 0.0 }
 0x35e   : > { %3754 = vmatprep.mubr.msk.f32.mxu1 %vm1834_vm1, %v2460_v50 }
 0x35f   : > { %3755 = vmatmul.mubr.msk.f32.gmra.mrb[162].mxu1 %vm1834_vm1, %v2461_v51 }
 0x360   : > { %v3647_v52 = vpop.f32.mrb[192].mxu0 }
 0x361   : > { %v2349_v53 = vadd.f32 %v3647_v52, %v4699_v33  ;;  %v2343_v54 = vpop.f32.mrb[193].mxu0 }
 0x362   : > { %v2344_v55 = vadd.f32 %v4699_v33, %v2343_v54 }
 0x363   : > { %v2463_v58 = vmax.f32 %v2349_v53, 0.0 }
 0x364   : > { %v2462_v57 = vmax.f32 %v2344_v55, 0.0 }
 0x366   : > { %3757 = vmatprep.mubr.msk.f32.mxu1 %vm1834_vm1, %v2462_v57 }
 0x367   : > { %3758 = vmatmul.mubr.msk.f32.gmra.mrb[164].mxu1 %vm1834_vm1, %v2463_v58 }
 0x368   : > { %v3650_v61 = vpop.f32.mrb[194].mxu0 }
 0x369   : > { %v2359_v0 = vadd.f32 %v3650_v61, %v4699_v33  ;;  %v2353_v56 = vpop.f32.mrb[195].mxu0 }
 0x36a   : > { %v2354_v3 = vadd.f32 %v4699_v33, %v2353_v56 }
 0x36b   : > { %v2465_v60 = vmax.f32 %v2359_v0, 0.0 }
 0x36c   : > { %v2464_v6 = vmax.f32 %v2354_v3, 0.0 }
 0x36e   : > { %3760 = vmatprep.mubr.msk.f32.mxu1 %vm1834_vm1, %v2464_v6 }
 0x36f   : > { %3761 = vmatmul.mubr.msk.f32.gmra.mrb[166].mxu1 %vm1834_vm1, %v2465_v60 }
 0x370   : > { %v3653_v11 = vpop.f32.mrb[196].mxu0 }
 0x371   : > { %v2369_v12 = vadd.f32 %v3653_v11, %v4699_v33  ;;  %v2363_v14 = vpop.f32.mrb[197].mxu0 }
 0x372   : > { %v2364_v15 = vadd.f32 %v4699_v33, %v2363_v14 }
 0x373   : > { %v2467_v59 = vmax.f32 %v2369_v12, 0.0 }
 0x374   : > { %v2466_v16 = vmax.f32 %v2364_v15, 0.0 }
 0x376   : > { %3763 = vmatprep.mubr.msk.f32.mxu1 %vm1834_vm1, %v2466_v16 }
 0x377   : > { %3764 = vmatmul.mubr.msk.f32.gmra.mrb[168].mxu1 %vm1834_vm1, %v2467_v59 }
 0x378   : > { %v3656_v18 = vpop.f32.mrb[198].mxu0 }
 0x379   : > { %v2379_v19 = vadd.f32 %v3656_v18, %v4699_v33  ;;  %v2373_v10 = vpop.f32.mrb[199].mxu0 }
 0x37a   : > { %v2374_v63 = vadd.f32 %v4699_v33, %v2373_v10 }
 0x37b   : > { %v2469_v20 = vmax.f32 %v2379_v19, 0.0 }
 0x37c   : > { %v2468_v17 = vmax.f32 %v2374_v63, 0.0 }
 0x37e   : > { %3766 = vmatprep.mubr.msk.f32.mxu1 %vm1834_vm1, %v2468_v17 }
 0x37f   : > { %3767 = vmatmul.mubr.msk.f32.gmra.mrb[170].mxu1 %vm1834_vm1, %v2469_v20 }
 0x380   : > { %v3659_v21 = vpop.f32.mrb[200].mxu0 }
 0x381   : > { %v2389_v22 = vadd.f32 %v3659_v21, %v4699_v33  ;;  %v2383_v23 = vpop.f32.mrb[201].mxu0 }
 0x382   : > { %v2384_v62 = vadd.f32 %v4699_v33, %v2383_v23 }
 0x383   : > { %v2471_v25 = vmax.f32 %v2389_v22, 0.0 }
 0x384   : > { %v2470_v24 = vmax.f32 %v2384_v62, 0.0 }
 0x386   : > { %3769 = vmatprep.mubr.msk.f32.mxu1 %vm1834_vm1, %v2470_v24 }
 0x387   : > { %3770 = vmatmul.mubr.msk.f32.gmra.mrb[172].mxu1 %vm1834_vm1, %v2471_v25 }
 0x388   : > { %v3662_v26 = vpop.f32.mrb[202].mxu0 }
 0x389   : > { %v2399_v27 = vadd.f32 %v3662_v26, %v4699_v33  ;;  %v2393_v28 = vpop.f32.mrb[203].mxu0 }
 0x38a   : > { %v2394_v29 = vadd.f32 %v4699_v33, %v2393_v28 }
 0x38b   : > { %v2473_v13 = vmax.f32 %v2399_v27, 0.0 }
 0x38c   : > { %v2472_v30 = vmax.f32 %v2394_v29, 0.0 }
 0x38e   : > { %3772 = vmatprep.mubr.msk.f32.mxu1 %vm1834_vm1, %v2472_v30 }
 0x38f   : > { %3773 = vmatmul.mubr.msk.f32.gmra.mrb[174].mxu1 %vm1834_vm1, %v2473_v13 }
 0x390   : > { %v3665_v31 = vpop.f32.mrb[204].mxu0 }
 0x391   : > { %v2409_v1 = vadd.f32 %v3665_v31, %v4699_v33  ;;  %v2403_v32 = vpop.f32.mrb[205].mxu0 }
 0x392   : > { %v2404_v34 = vadd.f32 %v4699_v33, %v2403_v32 }
 0x393   : > { %v2475_v5 = vmax.f32 %v2409_v1, 0.0 }
 0x394   : > { %v2474_v35 = vmax.f32 %v2404_v34, 0.0 }
 0x396   : > { %3775 = vmatprep.mubr.msk.f32.mxu1 %vm1834_vm1, %v2474_v35 }
 0x397   : > { %3776 = vmatmul.mubr.msk.f32.gmra.mrb[176].mxu1 %vm1834_vm1, %v2475_v5 }
 0x39a   : > { %v3684_v33 = vpop.f32.mrb[114].mxu1 }
 0x39b   : > { %v2755_v37 = vadd.f32 %v3684_v33, %v4832_v36  ;;  %v2749_v38 = vpop.f32.mrb[115].mxu1 }
 0x39c   : > { %v2750_v2 = vadd.f32 %v4832_v36, %v2749_v38 }
 0x39d   : > { %3069 = vst [vmem:[%s4839_s29 + $0x8] sm:$0xff] %v2755_v37 }
 0x39e   : > { %3068 = vst [vmem:[%s4839_s29] sm:$0xff] %v2750_v2 }
 0x3a2   : > { %v3687_v39 = vpop.f32.mrb[116].mxu1 }
 0x3a3   : > { %v2765_v40 = vadd.f32 %v3687_v39, %v4832_v36  ;;  %v2759_v4 = vpop.f32.mrb[117].mxu1 }
 0x3a4   : > { %v2760_v7 = vadd.f32 %v4832_v36, %v2759_v4 }
 0x3a5   : > { %3071 = vst [vmem:[%s4839_s29 + $0x18] sm:$0xff] %v2765_v40 }
 0x3a6   : > { %3070 = vst [vmem:[%s4839_s29 + $0x10] sm:$0xff] %v2760_v7 }
 0x3aa   : > { %v3690_v41 = vpop.f32.mrb[118].mxu1 }
 0x3ab   : > { %v2775_v9 = vadd.f32 %v3690_v41, %v4832_v36  ;;  %v2769_v42 = vpop.f32.mrb[119].mxu1 }
 0x3ac   : > { %v2770_v43 = vadd.f32 %v4832_v36, %v2769_v42 }
 0x3ad   : > { %3073 = vst [vmem:[%s4839_s29 + $0x28] sm:$0xff] %v2775_v9 }
 0x3ae   : > { %3072 = vst [vmem:[%s4839_s29 + $0x20] sm:$0xff] %v2770_v43 }
 0x3af   : > { %v3693_v44 = vpop.f32.mrb[120].mxu1 }
 0x3b0   : > { %v2785_v45 = vadd.f32 %v3693_v44, %v4832_v36  ;;  %v2779_v46 = vpop.f32.mrb[121].mxu1 }
 0x3b1   : > { %v2780_v47 = vadd.f32 %v4832_v36, %v2779_v46 }
 0x3b2   : > { %3075 = vst [vmem:[%s4839_s29 + $0x38] sm:$0xff] %v2785_v45 }
 0x3b3   : > { %3074 = vst [vmem:[%s4839_s29 + $0x30] sm:$0xff] %v2780_v47  ;;  %v3696_v8 = vpop.f32.mrb[122].mxu1 }
 0x3b4   : > { %v2795_v48 = vadd.f32 %v3696_v8, %v4832_v36  ;;  %v2789_v49 = vpop.f32.mrb[123].mxu1 }
 0x3b5   : > { %v2790_v50 = vadd.f32 %v4832_v36, %v2789_v49 }
 0x3b6   : > { %3077 = vst [vmem:[%s4839_s29 + $0x48] sm:$0xff] %v2795_v48 }
 0x3b7   : > { %3076 = vst [vmem:[%s4839_s29 + $0x40] sm:$0xff] %v2790_v50  ;;  %v3699_v51 = vpop.f32.mrb[124].mxu1 }
 0x3b8   : > { %v2805_v52 = vadd.f32 %v3699_v51, %v4832_v36  ;;  %v2799_v53 = vpop.f32.mrb[125].mxu1 }
 0x3b9   : > { %v2800_v54 = vadd.f32 %v4832_v36, %v2799_v53 }
 0x3ba   : > { %3079 = vst [vmem:[%s4839_s29 + $0x58] sm:$0xff] %v2805_v52 }
 0x3bb   : > { %3078 = vst [vmem:[%s4839_s29 + $0x50] sm:$0xff] %v2800_v54  ;;  %v3702_v55 = vpop.f32.mrb[126].mxu1 }
 0x3bc   : > { %v2815_v57 = vadd.f32 %v3702_v55, %v4832_v36  ;;  %v2809_v58 = vpop.f32.mrb[127].mxu1 }
 0x3bd   : > { %v2810_v61 = vadd.f32 %v4832_v36, %v2809_v58 }
 0x3be   : > { %3081 = vst [vmem:[%s4839_s29 + $0x68] sm:$0xff] %v2815_v57 }
 0x3bf   : > { %3080 = vst [vmem:[%s4839_s29 + $0x60] sm:$0xff] %v2810_v61  ;;  %v3705_v0 = vpop.f32.mrb[128].mxu1 }
 0x3c0   : > { %v2825_v56 = vadd.f32 %v3705_v0, %v4832_v36  ;;  %v2819_v3 = vpop.f32.mrb[129].mxu1 }
 0x3c1   : > { %v2820_v6 = vadd.f32 %v4832_v36, %v2819_v3 }
 0x3c2   : > { %3083 = vst [vmem:[%s4839_s29 + $0x78] sm:$0xff] %v2825_v56 }
 0x3c3   : > { %3082 = vst [vmem:[%s4839_s29 + $0x70] sm:$0xff] %v2820_v6  ;;  %v3708_v60 = vpop.f32.mrb[130].mxu1 }
 0x3c4   : > { %v2835_v11 = vadd.f32 %v3708_v60, %v4832_v36  ;;  %v2829_v12 = vpop.f32.mrb[131].mxu1 }
 0x3c5   : > { %v2830_v14 = vadd.f32 %v4832_v36, %v2829_v12 }
 0x3c6   : > { %3085 = vst [vmem:[%s4839_s29 + $0x88] sm:$0xff] %v2835_v11 }
 0x3c7   : > { %3084 = vst [vmem:[%s4839_s29 + $0x80] sm:$0xff] %v2830_v14  ;;  %v3711_v15 = vpop.f32.mrb[132].mxu1 }
 0x3c8   : > { %v2845_v16 = vadd.f32 %v3711_v15, %v4832_v36  ;;  %v2839_v59 = vpop.f32.mrb[133].mxu1 }
 0x3c9   : > { %v2840_v18 = vadd.f32 %v4832_v36, %v2839_v59 }
 0x3ca   : > { %3087 = vst [vmem:[%s4839_s29 + $0x98] sm:$0xff] %v2845_v16 }
 0x3cb   : > { %3086 = vst [vmem:[%s4839_s29 + $0x90] sm:$0xff] %v2840_v18  ;;  %v3714_v19 = vpop.f32.mrb[134].mxu1 }
 0x3cc   : > { %v2855_v10 = vadd.f32 %v3714_v19, %v4832_v36  ;;  %v2849_v63 = vpop.f32.mrb[135].mxu1 }
 0x3cd   : > { %v2850_v17 = vadd.f32 %v4832_v36, %v2849_v63 }
 0x3ce   : > { %3089 = vst [vmem:[%s4839_s29 + $0xa8] sm:$0xff] %v2855_v10 }
 0x3cf   : > { %3088 = vst [vmem:[%s4839_s29 + $0xa0] sm:$0xff] %v2850_v17  ;;  %v3717_v20 = vpop.f32.mrb[136].mxu1 }
 0x3d0   : > { %v2865_v21 = vadd.f32 %v3717_v20, %v4832_v36  ;;  %v2859_v22 = vpop.f32.mrb[137].mxu1 }
 0x3d1   : > { %v2860_v23 = vadd.f32 %v4832_v36, %v2859_v22 }
 0x3d2   : > { %3091 = vst [vmem:[%s4839_s29 + $0xb8] sm:$0xff] %v2865_v21 }
 0x3d3   : > { %3090 = vst [vmem:[%s4839_s29 + $0xb0] sm:$0xff] %v2860_v23  ;;  %v3720_v62 = vpop.f32.mrb[138].mxu1 }
 0x3d4   : > { %v2875_v24 = vadd.f32 %v3720_v62, %v4832_v36  ;;  %v2869_v25 = vpop.f32.mrb[139].mxu1 }
 0x3d5   : > { %v2870_v26 = vadd.f32 %v4832_v36, %v2869_v25 }
 0x3d6   : > { %3093 = vst [vmem:[%s4839_s29 + $0xc8] sm:$0xff] %v2875_v24 }
 0x3d7   : > { %3092 = vst [vmem:[%s4839_s29 + $0xc0] sm:$0xff] %v2870_v26 }
 0x3da   : > { %v3723_v27 = vpop.f32.mrb[140].mxu1 }
 0x3db   : > { %v2885_v28 = vadd.f32 %v3723_v27, %v4832_v36  ;;  %v2879_v29 = vpop.f32.mrb[141].mxu1 }
 0x3dc   : > { %v2880_v30 = vadd.f32 %v4832_v36, %v2879_v29 }
 0x3dd   : > { %3095 = vst [vmem:[%s4839_s29 + $0xd8] sm:$0xff] %v2885_v28 }
 0x3de   : > { %3094 = vst [vmem:[%s4839_s29 + $0xd0] sm:$0xff] %v2880_v30 }
 0x3e2   : > { %v3726_v13 = vpop.f32.mrb[142].mxu1 }
 0x3e3   : > { %v2895_v31 = vadd.f32 %v3726_v13, %v4832_v36  ;;  %v2889_v1 = vpop.f32.mrb[143].mxu1 }
 0x3e4   : > { %v2890_v32 = vadd.f32 %v4832_v36, %v2889_v1 }
 0x3e5   : > { %3097 = vst [vmem:[%s4839_s29 + $0xe8] sm:$0xff] %v2895_v31 }
 0x3e6   : > { %3096 = vst [vmem:[%s4839_s29 + $0xe0] sm:$0xff] %v2890_v32 }
 0x3ea   : > { %v3729_v34 = vpop.f32.mrb[144].mxu1 }
 0x3eb   : > { %v2905_v35 = vadd.f32 %v3729_v34, %v4832_v36  ;;  %v2899_v5 = vpop.f32.mrb[145].mxu1 }
 0x3ec   : > { %v2900_v33 = vadd.f32 %v4832_v36, %v2899_v5 }
 0x3ed   : > { %3099 = vst [vmem:[%s4839_s29 + $0xf8] sm:$0xff] %v2905_v35 }
 0x3ee   : > { %3098 = vst [vmem:[%s4839_s29 + $0xf0] sm:$0xff] %v2900_v33 }
 0x3f2   : > { %v3732_v37 = vpop.f32.mrb[146].mxu1 }
 0x3f3   : > { %v2915_v38 = vadd.f32 %v3732_v37, %v4832_v36  ;;  %v2909_v2 = vpop.f32.mrb[147].mxu1 }
 0x3f4   : > { %v2910_v39 = vadd.f32 %v4832_v36, %v2909_v2 }
 0x3f5   : > { %3101 = vst [vmem:[%s4839_s29 + $0x108] sm:$0xff] %v2915_v38 }
 0x3f6   : > { %3100 = vst [vmem:[%s4839_s29 + $0x100] sm:$0xff] %v2910_v39 }
 0x3fa   : > { %v3735_v40 = vpop.f32.mrb[148].mxu1 }
 0x3fb   : > { %v2925_v4 = vadd.f32 %v3735_v40, %v4832_v36  ;;  %v2919_v7 = vpop.f32.mrb[149].mxu1 }
 0x3fc   : > { %v2920_v41 = vadd.f32 %v4832_v36, %v2919_v7 }
 0x3fd   : > { %3103 = vst [vmem:[%s4839_s29 + $0x118] sm:$0xff] %v2925_v4 }
 0x3fe   : > { %3102 = vst [vmem:[%s4839_s29 + $0x110] sm:$0xff] %v2920_v41 }
 0x402   : > { %v3738_v9 = vpop.f32.mrb[150].mxu1 }
 0x403   : > { %v2935_v42 = vadd.f32 %v3738_v9, %v4832_v36  ;;  %v2929_v43 = vpop.f32.mrb[151].mxu1 }
 0x404   : > { %v2930_v44 = vadd.f32 %v4832_v36, %v2929_v43 }
 0x405   : > { %3105 = vst [vmem:[%s4839_s29 + $0x128] sm:$0xff] %v2935_v42 }
 0x406   : > { %3104 = vst [vmem:[%s4839_s29 + $0x120] sm:$0xff] %v2930_v44 }
 0x40a   : > { %v3741_v45 = vpop.f32.mrb[152].mxu1 }
 0x40b   : > { %v2945_v46 = vadd.f32 %v3741_v45, %v4832_v36  ;;  %v2939_v47 = vpop.f32.mrb[153].mxu1 }
 0x40c   : > { %v2940_v8 = vadd.f32 %v4832_v36, %v2939_v47 }
 0x40d   : > { %3107 = vst [vmem:[%s4839_s29 + $0x138] sm:$0xff] %v2945_v46 }
 0x40e   : > { %3106 = vst [vmem:[%s4839_s29 + $0x130] sm:$0xff] %v2940_v8 }
 0x412   : > { %v3744_v48 = vpop.f32.mrb[154].mxu1 }
 0x413   : > { %v2955_v49 = vadd.f32 %v3744_v48, %v4832_v36  ;;  %v2949_v50 = vpop.f32.mrb[155].mxu1 }
 0x414   : > { %v2950_v51 = vadd.f32 %v4832_v36, %v2949_v50 }
 0x415   : > { %3109 = vst [vmem:[%s4839_s29 + $0x148] sm:$0xff] %v2955_v49 }
 0x416   : > { %3108 = vst [vmem:[%s4839_s29 + $0x140] sm:$0xff] %v2950_v51 }
 0x41a   : > { %v3747_v52 = vpop.f32.mrb[156].mxu1 }
 0x41b   : > { %v2965_v53 = vadd.f32 %v3747_v52, %v4832_v36  ;;  %v2959_v54 = vpop.f32.mrb[157].mxu1 }
 0x41c   : > { %v2960_v55 = vadd.f32 %v4832_v36, %v2959_v54 }
 0x41d   : > { %3111 = vst [vmem:[%s4839_s29 + $0x158] sm:$0xff] %v2965_v53 }
 0x41e   : > { %3110 = vst [vmem:[%s4839_s29 + $0x150] sm:$0xff] %v2960_v55 }
 0x422   : > { %v3750_v57 = vpop.f32.mrb[158].mxu1 }
 0x423   : > { %v2975_v58 = vadd.f32 %v3750_v57, %v4832_v36  ;;  %v2969_v61 = vpop.f32.mrb[159].mxu1 }
 0x424   : > { %v2970_v0 = vadd.f32 %v4832_v36, %v2969_v61 }
 0x425   : > { %3113 = vst [vmem:[%s4839_s29 + $0x168] sm:$0xff] %v2975_v58 }
 0x426   : > { %3112 = vst [vmem:[%s4839_s29 + $0x160] sm:$0xff] %v2970_v0 }
 0x42a   : > { %v3753_v56 = vpop.f32.mrb[160].mxu1 }
 0x42b   : > { %v2985_v3 = vadd.f32 %v3753_v56, %v4832_v36  ;;  %v2979_v6 = vpop.f32.mrb[161].mxu1 }
 0x42c   : > { %v2980_v60 = vadd.f32 %v4832_v36, %v2979_v6 }
 0x42d   : > { %3115 = vst [vmem:[%s4839_s29 + $0x178] sm:$0xff] %v2985_v3 }
 0x42e   : > { %3114 = vst [vmem:[%s4839_s29 + $0x170] sm:$0xff] %v2980_v60 }
 0x432   : > { %v3756_v11 = vpop.f32.mrb[162].mxu1 }
 0x433   : > { %v2995_v12 = vadd.f32 %v3756_v11, %v4832_v36  ;;  %v2989_v14 = vpop.f32.mrb[163].mxu1 }
 0x434   : > { %v2990_v15 = vadd.f32 %v4832_v36, %v2989_v14 }
 0x435   : > { %3117 = vst [vmem:[%s4839_s29 + $0x188] sm:$0xff] %v2995_v12 }
 0x436   : > { %3116 = vst [vmem:[%s4839_s29 + $0x180] sm:$0xff] %v2990_v15 }
 0x43a   : > { %v3759_v16 = vpop.f32.mrb[164].mxu1 }
 0x43b   : > { %v3005_v59 = vadd.f32 %v3759_v16, %v4832_v36  ;;  %v2999_v18 = vpop.f32.mrb[165].mxu1 }
 0x43c   : > { %v3000_v19 = vadd.f32 %v4832_v36, %v2999_v18 }
 0x43d   : > { %3119 = vst [vmem:[%s4839_s29 + $0x198] sm:$0xff] %v3005_v59 }
 0x43e   : > { %3118 = vst [vmem:[%s4839_s29 + $0x190] sm:$0xff] %v3000_v19 }
 0x442   : > { %v3762_v10 = vpop.f32.mrb[166].mxu1 }
 0x443   : > { %v3015_v63 = vadd.f32 %v3762_v10, %v4832_v36  ;;  %v3009_v17 = vpop.f32.mrb[167].mxu1 }
 0x444   : > { %v3010_v20 = vadd.f32 %v4832_v36, %v3009_v17 }
 0x445   : > { %3121 = vst [vmem:[%s4839_s29 + $0x1a8] sm:$0xff] %v3015_v63 }
 0x446   : > { %3120 = vst [vmem:[%s4839_s29 + $0x1a0] sm:$0xff] %v3010_v20 }
 0x44a   : > { %v3765_v21 = vpop.f32.mrb[168].mxu1 }
 0x44b   : > { %v3025_v22 = vadd.f32 %v3765_v21, %v4832_v36  ;;  %v3019_v23 = vpop.f32.mrb[169].mxu1 }
 0x44c   : > { %v3020_v62 = vadd.f32 %v4832_v36, %v3019_v23 }
 0x44d   : > { %3123 = vst [vmem:[%s4839_s29 + $0x1b8] sm:$0xff] %v3025_v22 }
 0x44e   : > { %3122 = vst [vmem:[%s4839_s29 + $0x1b0] sm:$0xff] %v3020_v62 }
 0x452   : > { %v3768_v24 = vpop.f32.mrb[170].mxu1 }
 0x453   : > { %v3035_v25 = vadd.f32 %v3768_v24, %v4832_v36  ;;  %v3029_v26 = vpop.f32.mrb[171].mxu1 }
 0x454   : > { %v3030_v27 = vadd.f32 %v4832_v36, %v3029_v26 }
 0x455   : > { %3125 = vst [vmem:[%s4839_s29 + $0x1c8] sm:$0xff] %v3035_v25 }
 0x456   : > { %3124 = vst [vmem:[%s4839_s29 + $0x1c0] sm:$0xff] %v3030_v27 }
 0x45a   : > { %v3771_v28 = vpop.f32.mrb[172].mxu1 }
 0x45b   : > { %v3045_v29 = vadd.f32 %v3771_v28, %v4832_v36  ;;  %v3039_v30 = vpop.f32.mrb[173].mxu1 }
 0x45c   : > { %v3040_v13 = vadd.f32 %v4832_v36, %v3039_v30 }
 0x45d   : > { %3127 = vst [vmem:[%s4839_s29 + $0x1d8] sm:$0xff] %v3045_v29 }
 0x45e   : > { %3126 = vst [vmem:[%s4839_s29 + $0x1d0] sm:$0xff] %v3040_v13 }
 0x462   : > { %v3774_v31 = vpop.f32.mrb[174].mxu1 }
 0x463   : > { %v3055_v1 = vadd.f32 %v3774_v31, %v4832_v36  ;;  %v3049_v32 = vpop.f32.mrb[175].mxu1 }
 0x464   : > { %v3050_v34 = vadd.f32 %v4832_v36, %v3049_v32 }
 0x465   : > { %3129 = vst [vmem:[%s4839_s29 + $0x1e8] sm:$0xff] %v3055_v1 }
 0x466   : > { %3128 = vst [vmem:[%s4839_s29 + $0x1e0] sm:$0xff] %v3050_v34 }
 0x46a   : > { %v3777_v35 = vpop.f32.mrb[176].mxu1 }
 0x46b   : > { %v3065_v5 = vadd.f32 %v3777_v35, %v4832_v36  ;;  %v3059_v33 = vpop.f32.mrb[177].mxu1 }
 0x46c   : > { %v3060_v37 = vadd.f32 %v4832_v36, %v3059_v33 }
 0x46d   : > { %3131 = vst [vmem:[%s4839_s29 + $0x1f8] sm:$0xff] %v3065_v5 }
 0x46e   : > { %3130 = vst [vmem:[%s4839_s29 + $0x1f0] sm:$0xff] %v3060_v37 }
 0x46f PF: > { %s19_s30 = sadd.s32 1, %s3914_s30  }
 0x470   : > { %p16_p4 = scmp.ge.s32.totalorder %s19_s30, 4  }
 0x472   :  { %18 = sbr.rel (!%p16_p4) target bundleno = 1 (0x1), region = 89 }

</bundles_post_ra>
